<compile_context>
chip_gen: v7x
topology: tpu7x:2x2x1
jax: 0.10.0
libtpu: 0.0.40
codegen_flags: <defaults>
</compile_context>

<pallas_src>
import functools

import numpy as np
import jax
import jax.numpy as jnp
from jax.experimental import pallas as pl
from jax.experimental.pallas import tpu as pltpu


# ----------------------------- Pallas kernel --------------------------------
def _fnn_analysis_kernel(x_ref, w_ref, o_real_ref, o_imag_ref, *, compute_dtype, precision):
    # Activation arrives f32 from HBM; cast (if requested) happens here on the VPU so the
    # wrapper never makes an extra HBM pass over x.
    x = x_ref[...]
    if x.dtype != compute_dtype:
        x = x.astype(compute_dtype)
    # Single fused MXU contraction: (tm, sz) @ (sz, 2*half_n_pad), f32 accumulation.
    acc = jnp.dot(
        x, w_ref[...], preferred_element_type=jnp.float32, precision=precision
    )
    hp = o_real_ref.shape[-1]                      # half_n_pad (multiple of 128 -> aligned split)
    o_real_ref[...] = acc[:, :hp].astype(o_real_ref.dtype)
    o_imag_ref[...] = acc[:, hp:].astype(o_imag_ref.dtype)


# ------------------------ weight folding (static precompute) -----------------
def fold_analysis_weights(w_real, w_imag, *, compute_dtype=jnp.bfloat16):
    """From the two PyTorch Linear weights (sz, sz), build the fused right-multiply
    matrix (sz, 2*half_n_pad) so both sliced outputs come out of one matmul.
    Only the first half_N output columns (lane-padded to a multiple of 128) are kept."""
    sz = w_real.shape[0]
    half_n = sz // 2 + 1
    half_n_pad = max(128, ((half_n + 127) // 128) * 128)   # lane-align output columns
    pad = half_n_pad - half_n
    # nn.Linear: y = x @ W.T ; keep only the first half_N output columns.
    wr = np.pad(np.asarray(w_real).T[:, :half_n], ((0, 0), (0, pad)))
    wi = np.pad(np.asarray(w_imag).T[:, :half_n], ((0, 0), (0, pad)))
    fused = np.concatenate([wr, wi], axis=1)               # (sz, 2*half_n_pad)
    return jnp.asarray(fused, dtype=compute_dtype), half_n, half_n_pad


# ------------------------------- tile selection -------------------------------
def _round_up(x, m):
    return ((x + m - 1) // m) * m


def _pick_tm(m, requested):
    """Big row tiles (mem-bound kernel wants ~1024 rows/step) but keep >= ~8 grid steps
    so the pipeline and both v7x TensorCores stay busy.  tm is a multiple of 256."""
    tm = 1024 if requested is None else requested
    target = max(256, _round_up(pl.cdiv(m, 8), 256))
    return min(tm, target)


# ------------------------------- wrapper -------------------------------------
def fnn_analysis(wave_form, fused_w, half_n, half_n_pad, *, tm=None,
                 out_dtype=jnp.float32, precision=None, slice_output=True):
    """wave_form: (B, T, sz) f32; fused_w: (sz, 2*half_n_pad) f32/bf16.
    Returns (an_real, an_imag): (B, T, half_n) if slice_output else lane-aligned
    (B, T, half_n_pad) (consumer slices [..., :half_n])."""
    B, T, sz = wave_form.shape
    n_out = 2 * half_n_pad
    compute_dtype = np.dtype(fused_w.dtype)
    out_dtype = np.dtype(out_dtype)

    M = B * T
    x = wave_form.reshape(M, sz)                  # leading-dim collapse: free, no copy
    tm = _pick_tm(M, tm)
    grid = (pl.cdiv(M, tm),)                      # ragged last block handled by Pallas masking

    cost = pl.CostEstimate(
        flops=2 * M * sz * n_out,
        transcendentals=0,
        bytes_accessed=(M * sz * x.dtype.itemsize                    # f32 activation read
                        + sz * n_out * compute_dtype.itemsize        # resident weights
                        + 2 * M * half_n_pad * out_dtype.itemsize),  # two padded outputs
    )

    kernel = functools.partial(
        _fnn_analysis_kernel, compute_dtype=compute_dtype, precision=precision
    )

    out_real, out_imag = pl.pallas_call(
        kernel,
        out_shape=(jax.ShapeDtypeStruct((M, half_n_pad), out_dtype),
                   jax.ShapeDtypeStruct((M, half_n_pad), out_dtype)),
        grid_spec=pltpu.PrefetchScalarGridSpec(
            num_scalar_prefetch=0,
            grid=grid,
            in_specs=[
                pl.BlockSpec((tm, sz), lambda i: (i, 0)),     # activation row tile
                pl.BlockSpec((sz, n_out), lambda i: (0, 0)),  # fused weights, resident
            ],
            out_specs=[
                pl.BlockSpec((tm, half_n_pad), lambda i: (i, 0)),   # lane-dense real
                pl.BlockSpec((tm, half_n_pad), lambda i: (i, 0)),   # lane-dense imag
            ],
        ),
        compiler_params=pltpu.CompilerParams(
            dimension_semantics=("parallel",),    # shard row axis across TCs (v7x megacore)
        ),
        cost_estimate=cost,
    )(x, fused_w)

    an_real = out_real.reshape(B, T, half_n_pad)  # leading-dim split: free, no copy
    an_imag = out_imag.reshape(B, T, half_n_pad)
    if slice_output:
        # Exact module semantics.  NOTE: this slice is not lane-aligned and materializes
        # a copy; prefer slice_output=False and slice at the consumer when possible.
        an_real = an_real[..., :half_n]
        an_imag = an_imag[..., :half_n]
    return an_real, an_imag


# ------------------------- deterministic parameter init ----------------------
def make_fourier_weights(sz):
    """FNNAnalysis.initialize(): Linear weights = real/imag of the ortho DFT matrix."""
    f_matrix = np.fft.fft(np.eye(sz), norm="ortho")
    return (np.real(f_matrix).astype(np.float32),
            np.imag(f_matrix).astype(np.float32))


# ------------------------------------ main ------------------------------------
if __name__ == "__main__":
    sz = 128               # ft_size (small, lane/MXU friendly)
    half_n = sz // 2 + 1   # 65
    B, T = 2, 8            # (batch, frames) -> M = 16 rows (toy size)

    key = jax.random.PRNGKey(0)
    wave = jax.random.normal(key, (B, T, sz), dtype=jnp.float32)

    w_real, w_imag = make_fourier_weights(sz)

    # Full-precision numpy reference of the PyTorch forward.
    wave_np = np.asarray(wave)
    ref_real = (wave_np @ w_real.T)[:, :, :half_n]
    ref_imag = (wave_np @ w_imag.T)[:, :, :half_n]

    # 1) Strict f32 path (HIGHEST matmul precision), exact module output shapes.
    fused_f32, hn, hnp = fold_analysis_weights(w_real, w_imag, compute_dtype=jnp.float32)
    ar32, ai32 = jax.block_until_ready(
        fnn_analysis(wave, fused_f32, hn, hnp, precision=jax.lax.Precision.HIGHEST))
    assert ar32.shape == (B, T, half_n) and ai32.shape == (B, T, half_n)
    np.testing.assert_allclose(np.asarray(ar32), ref_real, rtol=1e-4, atol=1e-4)
    np.testing.assert_allclose(np.asarray(ai32), ref_imag, rtol=1e-4, atol=1e-4)

    # 2) bf16-operand / f32-accumulate fast path, lane-aligned padded outputs
    #    (the optimized production path: no extra HBM passes in the wrapper).
    fused_bf16, hn, hnp = fold_analysis_weights(w_real, w_imag, compute_dtype=jnp.bfloat16)
    ar16, ai16 = jax.block_until_ready(
        fnn_analysis(wave, fused_bf16, hn, hnp, slice_output=False))
    assert ar16.shape == (B, T, hnp)
    np.testing.assert_allclose(np.asarray(ar16)[..., :hn], ref_real, rtol=5e-2, atol=5e-2)
    np.testing.assert_allclose(np.asarray(ai16)[..., :hn], ref_imag, rtol=5e-2, atol=5e-2)

    # 3) bf16-output variant (halves output bytes; useful on bandwidth-starved v5e).
    ar16o, ai16o = jax.block_until_ready(
        fnn_analysis(wave, fused_bf16, hn, hnp, out_dtype=jnp.bfloat16, slice_output=False))
    np.testing.assert_allclose(np.asarray(ar16o).astype(np.float32)[..., :hn],
                               ref_real, rtol=5e-2, atol=5e-2)
    np.testing.assert_allclose(np.asarray(ai16o).astype(np.float32)[..., :hn],
                               ref_imag, rtol=5e-2, atol=5e-2)

    print("KERNEL_OK")
</pallas_src>

<mosaic_0001>
module attributes {stable_mosaic.version = 11 : i64} {
  func.func @_fnn_analysis_kernel(%arg0: i32, %arg1: memref<256x128xf32, #tpu.memory_space<vmem>>, %arg2: memref<128x256xf32, #tpu.memory_space<vmem>>, %arg3: memref<256x128xf32, #tpu.memory_space<vmem>>, %arg4: memref<256x128xf32, #tpu.memory_space<vmem>>) attributes {dimension_semantics = [#tpu.dimension_semantics<parallel>], iteration_bounds = array<i64: 1>, scalar_prefetch = 0 : i64, scratch_operands = 0 : i64, tpu.core_type = #tpu.core_type<tc>, window_params = [{transform_indices = @transform_0, window_bounds = array<i64: 256, 128>}, {pipeline_mode = #tpu.pipeline_mode<synchronous>, transform_indices = @transform_1, window_bounds = array<i64: 128, 256>}, {transform_indices = @transform_2, window_bounds = array<i64: 256, 128>}, {transform_indices = @transform_3, window_bounds = array<i64: 256, 128>}]} {
    %c0 = arith.constant 0 : index
    %c0_0 = arith.constant 0 : index
    %0 = vector.load %arg1[%c0, %c0_0] : memref<256x128xf32, #tpu.memory_space<vmem>>, vector<256x128xf32>
    %c0_1 = arith.constant 0 : index
    %c0_2 = arith.constant 0 : index
    %1 = vector.load %arg2[%c0_1, %c0_2] : memref<128x256xf32, #tpu.memory_space<vmem>>, vector<128x256xf32>
    %cst = arith.constant dense<0.000000e+00> : vector<256x256xf32>
    %2 = tpu.matmul %0, %1, %cst {dimension_numbers = #tpu.dot_dimension_numbers<[1], [0], [0], [1], [0, 0, 1, 1], [], []>, precision = #tpu.contract_precision<fp32>} : vector<256x128xf32>, vector<128x256xf32>, vector<256x256xf32> -> vector<256x256xf32>
    %3 = vector.extract_strided_slice %2 {offsets = [0, 0], sizes = [256, 128], strides = [1, 1]} : vector<256x256xf32> to vector<256x128xf32>
    %c0_3 = arith.constant 0 : index
    %c0_4 = arith.constant 0 : index
    %4 = vector.load %arg3[%c0_3, %c0_4] : memref<256x128xf32, #tpu.memory_space<vmem>>, vector<256x128xf32>
    tpu.vector_store %arg3[%c0_3, %c0_4], %3 {strides = array<i32>} : memref<256x128xf32, #tpu.memory_space<vmem>>, vector<256x128xf32>,
    %5 = vector.extract_strided_slice %2 {offsets = [0, 128], sizes = [256, 128], strides = [1, 1]} : vector<256x256xf32> to vector<256x128xf32>
    %c0_5 = arith.constant 0 : index
    %c0_6 = arith.constant 0 : index
    %6 = vector.load %arg4[%c0_5, %c0_6] : memref<256x128xf32, #tpu.memory_space<vmem>>, vector<256x128xf32>
    tpu.vector_store %arg4[%c0_5, %c0_6], %5 {strides = array<i32>} : memref<256x128xf32, #tpu.memory_space<vmem>>, vector<256x128xf32>,
    return
  }
  func.func @transform_0(%arg0: i32) -> (i32, i32) {
    %c0_i32 = arith.constant 0 : i32
    %c0_i32_0 = arith.constant 0 : i32
    return %arg0, %c0_i32 : i32, i32
  }
  func.func @transform_1(%arg0: i32) -> (i32, i32) {
    %c0_i32 = arith.constant 0 : i32
    %c0_i32_0 = arith.constant 0 : i32
    %c0_i32_1 = arith.constant 0 : i32
    return %c0_i32, %c0_i32_0 : i32, i32
  }
  func.func @transform_2(%arg0: i32) -> (i32, i32) {
    %c0_i32 = arith.constant 0 : i32
    %c0_i32_0 = arith.constant 0 : i32
    return %arg0, %c0_i32 : i32, i32
  }
  func.func @transform_3(%arg0: i32) -> (i32, i32) {
    %c0_i32 = arith.constant 0 : i32
    %c0_i32_0 = arith.constant 0 : i32
    return %arg0, %c0_i32 : i32, i32
  }
}

</mosaic_0001>

<bundles_post_ra>
// kernel: tpu_custom_call.1
= control target key start
LH: loop header
LB: loop body
LE: loop exit
PB: predicated region body
PF: predicated region fallthrough
CT: control target
= control target key end

     0   :  { %9 = vsyncpa [#allocation3], 0  ;;  %s4398_s0 = inlined_call_operand.hbm [shape: f32[16,128], index: 0, kind: input, shape index: {}]   ;;  %s4399_s1 = inlined_call_operand.hbm [shape: f32[128,256], index: 1, kind: input, shape index: {}]   ;;  %s4400_s2 = inlined_call_operand.hbm [shape: f32[16,128], index: 2, kind: output, shape index: {0}]   ;;  %s4401_s3 = inlined_call_operand.hbm [shape: f32[16,128], index: 3, kind: output, shape index: {1}]  }
   0x1   :  { %10 = vsyncpa [#allocation6], 0 }
   0x2   :  { %11 = vsyncpa [#allocation4], 0 }
   0x3   :  { %12 = vsyncpa [#allocation9], 0 }
   0x4   :  { %17 = vsyncadd [#allocation3], 3840  ;;  %s3196_s12 = smov [#allocation2]   ;;  %s3100_s16 = scalar_lea.hbm %s4398_s0, 256 }
   0x5   :  { %s18_s13 = sshll.u32 %s3196_s12, 4  ;;  %p3101_p0 = scmp.ne.s32.totalorder %s4398_s0, %s3100_s16  ;;  %s19_s13 = int_to_ptr.vmem [resolvable:$true] %s18_s13 }
   0x6   :  { %p3104_p1 = scmp.lt.u32.totalorder %s3100_s16, %s4398_s0 }
   0x8   :  { %p3106_p2 = pnand %p3104_p1, %p3101_p0 }
   0xa   :  { %3109 = shalt.err (!%p3106_p2)
}
   0xb   :  { %s3110_s21 = scalar_lea.vmem %s19_s13, 256  ;;  %s3114_s22 = scalar_lea.vmem %s19_s13, 4096 }
   0xc   :  { %p3111_p3 = scmp.ne.s32.totalorder %s19_s13, %s3110_s21  ;;  %p3115_p4 = scmp.lt.s32.totalorder %s19_s13, %s19_s13 }
   0xd   :  { %p3116_p5 = scmp.lt.s32.totalorder %s3114_s22, %s3110_s21 }
   0xf   :  { %p3117_p6 = por %p3116_p5, %p3115_p4 }
  0x11   :  { %p3118_p7 = pnand %p3117_p6, %p3111_p3 }
  0x13   :  { %3121 = shalt.err (!%p3118_p7)
}
  0x14   :  { %s3197_s23 = smov 128   ;;  %s3198_s24 = smov 8  }
  0x15   :  { %24 = dma.hbm_to_vmem [thread:$0]  %s4398_s0, 256, %s19_s13, [#allocation3], %s3197_s23, %s3197_s23, %s3198_s24  }
  0x16   :  { %s3199_s27 = smov [#allocation5]   ;;  %s3122_s4 = scalar_lea.hbm %s4399_s1, 4096 }
  0x17   :  { %s30_s28 = sshll.u32 %s3199_s27, 4  ;;  %p3123_p8 = scmp.ne.s32.totalorder %s4399_s1, %s3122_s4  ;;  %s31_s28 = int_to_ptr.vmem [resolvable:$true] %s30_s28 }
  0x18   :  { %p3126_p9 = scmp.lt.u32.totalorder %s3122_s4, %s4399_s1 }
  0x1a   :  { %p3128_p10 = pnand %p3126_p9, %p3123_p8 }
  0x1c   :  { %3131 = shalt.err (!%p3128_p10)
}
  0x1d   :  { %s3132_s9 = scalar_lea.vmem %s31_s28, 4096  ;;  %p3137_p12 = scmp.lt.s32.totalorder %s31_s28, %s31_s28 }
  0x1e   :  { %p3133_p11 = scmp.ne.s32.totalorder %s31_s28, %s3132_s9  ;;  %p3138_p13 = scmp.lt.s32.totalorder %s3132_s9, %s3132_s9 }
  0x20   :  { %p3139_p0 = por %p3138_p13, %p3137_p12 }
  0x22   :  { %p3140_p1 = pnand %p3139_p0, %p3133_p11 }
  0x24   :  { %3143 = shalt.err (!%p3140_p1)
}
  0x25   :  { %s3200_s0 = smov 256   ;;  %s3201_s10 = smov 16  }
  0x26   :  { %36 = dma.hbm_to_vmem [thread:$0]  %s4399_s1, 4096, %s31_s28, [#allocation6], %s3200_s0, %s3200_s0, %s3201_s10  }
  0x27   :  { %3188 = dma.done.wait [#allocation3], 4096  }
  0x28   :  { %3189 = vsyncadd [#allocation3], 4294963200 }
  0x29   :  { %3190 = dma.done.wait [#allocation6], 4096  }
  0x2a   :  { %3191 = vsyncadd [#allocation6], 4294963200  ;;  %v4410_v0 = vmov 0.0   ;;  %v3254_v1 = vld [vmem:[#allocation5 + $0x8] sm:$0xff]  ;;  %v3256_v2 = vld [vmem:[#allocation5 + $0x18] sm:$0xff] }
  0x2b   :  { %203 = vmatprep.mubr.f32.mxu1 %v4410_v0  ;;  %1486 = vmatprep.mubr.f32.mxu0 %v4410_v0  ;;  %v3258_v3 = vld [vmem:[#allocation5] sm:$0xff]  ;;  %v107_v4 = vand.u32 4294901760, %v3254_v1  ;;  %v111_v5 = vand.u32 4294901760, %v3256_v2  ;;  %v3262_v6 = vld [vmem:[#allocation5 + $0x10] sm:$0xff]  ;;  %v3265_v8 = vld [vmem:[#allocation5 + $0x28] sm:$0xff] }
  0x2c   :  { %v109_v7 = vand.u32 4294901760, %v3258_v3  ;;  %v3267_v9 = vld [vmem:[#allocation5 + $0x38] sm:$0xff]  ;;  %v113_v10 = vand.u32 4294901760, %v3262_v6  ;;  %v115_v11 = vand.u32 4294901760, %v3265_v8  ;;  %v3272_v13 = vld [vmem:[#allocation5 + $0x20] sm:$0xff]  ;;  %v3274_v14 = vld [vmem:[#allocation5 + $0x30] sm:$0xff] }
  0x2d   :  { %v119_v12 = vand.u32 4294901760, %v3267_v9  ;;  %v3276_v15 = vld [vmem:[#allocation5 + $0x48] sm:$0xff]  ;;  %v3282_v16 = vpack.c.bf16 %v111_v5, %v107_v4  ;;  %v3284_v17 = vld [vmem:[#allocation5 + $0x58] sm:$0xff]  ;;  %v3286_v18 = vld [vmem:[#allocation5 + $0x40] sm:$0xff]  ;;  %v117_v24 = vand.u32 4294901760, %v3272_v13  ;;  %v121_v25 = vand.u32 4294901760, %v3274_v14 }
  0x2e   :  { %v3288_v19 = vld [vmem:[#allocation5 + $0x50] sm:$0xff]  ;;  %v3294_v20 = vpack.c.bf16 %v113_v10, %v109_v7  ;;  %v3302_v22 = vld [vmem:[#allocation5 + $0x68] sm:$0xff]  ;;  %v3304_v23 = vld [vmem:[#allocation5 + $0x78] sm:$0xff]  ;;  %v123_v26 = vand.u32 4294901760, %v3276_v15  ;;  %v4420_v27 = vand.u32 4294901760, %v3284_v17  ;;  %v4419_v28 = vand.u32 4294901760, %v3286_v18 }
  0x2f   :  { %v3300_v21 = vpack.c.bf16 %v119_v12, %v115_v11  ;;  %2580 = vmatprep.subr.bf16.mxu1 %v3282_v16  ;;  %2676 = vmatprep.subr.bf16.mxu0 %v3282_v16  ;;  %v4418_v29 = vand.u32 4294901760, %v3288_v19  ;;  %v3322_v30 = vpack.c.bf16 %v121_v25, %v117_v24  ;;  %v4417_v31 = vand.u32 4294901760, %v3302_v22  ;;  %v3326_v33 = vld [vmem:[#allocation5 + $0x60] sm:$0xff]  ;;  %v3328_v34 = vld [vmem:[#allocation5 + $0x70] sm:$0xff]  ;;  %v3336_v36 = vld [vmem:[#allocation5 + $0x88] sm:$0xff] }
  0x30   :  { %4496 = vst [vmem:[#allocation14_spill] sm:$0xff] %v3294_v20  ;;  %2582 = vmatpush1.bf16.msra.mxu1 %v3294_v20  ;;  %2678 = vmatpush1.bf16.msra.mxu0 %v3294_v20  ;;  %v4416_v32 = vand.u32 4294901760, %v3304_v23  ;;  %v3334_v35 = vpack.c.bf16 %v4420_v27, %v123_v26  ;;  %v3338_v37 = vld [vmem:[#allocation5 + $0x98] sm:$0xff]  ;;  %v4409_v39 = vand.u32 4294901760, %v3326_v33  ;;  %v4408_v40 = vand.u32 4294901760, %v3328_v34  ;;  %v3360_v44 = vld [vmem:[#allocation5 + $0x80] sm:$0xff] }
  0x31   :  { %4497 = vst [vmem:[#allocation15_spill] sm:$0xff] %v3300_v21  ;;  %2584 = vmatprep.subr.bf16.mxu1 %v3300_v21  ;;  %2680 = vmatprep.subr.bf16.mxu0 %v3300_v21  ;;  %4498 = vst [vmem:[#allocation16_spill] sm:$0xff] %v3322_v30  ;;  %v3346_v38 = vpack.c.bf16 %v4418_v29, %v4419_v28  ;;  %v4403_v42 = vand.u32 4294901760, %v3336_v36  ;;  %v4402_v43 = vand.u32 4294901760, %v3338_v37  ;;  %v3362_v45 = vld [vmem:[#allocation5 + $0x90] sm:$0xff]  ;;  %v3364_v46 = vld [vmem:[#allocation5 + $0xa8] sm:$0xff] }
  0x32   :  { %4499 = vst [vmem:[#allocation17_spill] sm:$0xff] %v3334_v35  ;;  %v3356_v41 = vpack.c.bf16 %v4416_v32, %v4417_v31  ;;  %v3366_v47 = vld [vmem:[#allocation5 + $0xb8] sm:$0xff]  ;;  %v3368_v48 = vld [vmem:[#allocation5 + $0xa0] sm:$0xff]  ;;  %v3376_v49 = vpack.c.bf16 %v4408_v40, %v4409_v39  ;;  %v4405_v50 = vand.u32 4294901760, %v3360_v44  ;;  %v4404_v51 = vand.u32 4294901760, %v3362_v45  ;;  %v3380_v52 = vld [vmem:[#allocation5 + $0xb0] sm:$0xff] }
  0x33   :  { %4500 = vst [vmem:[#allocation18_spill] sm:$0xff] %v3346_v38  ;;  %v3382_v53 = vld [vmem:[#allocation5 + $0xc8] sm:$0xff]  ;;  %v3384_v54 = vld [vmem:[#allocation5 + $0xd8] sm:$0xff]  ;;  %v3392_v55 = vpack.c.bf16 %v4402_v43, %v4403_v42  ;;  %v4407_v56 = vand.u32 4294901760, %v3364_v46  ;;  %v4406_v57 = vand.u32 4294901760, %v3366_v47  ;;  %v3399_v58 = vsub.f32 %v3254_v1, %v107_v4  ;;  %v43_v43 = vld [vmem:[#allocation2] sm:$0xff] }
  0x34   :  { %2586 = vmatpush1.bf16.msra.mxu1 %v3322_v30  ;;  %2682 = vmatpush1.bf16.msra.mxu0 %v3322_v30  ;;  %4501 = vst [vmem:[#allocation19_spill] sm:$0xff] %v3356_v41  ;;  %4502 = vst [vmem:[#allocation20_spill] sm:$0xff] %v3376_v49  ;;  %v3404_v59 = vsub.f32 %v3256_v2, %v111_v5  ;;  %v4413_v60 = vand.u32 4294901760, %v3368_v48  ;;  %v4412_v61 = vand.u32 4294901760, %v3380_v52  ;;  %v4415_v62 = vand.u32 4294901760, %v3382_v53  ;;  %v3428_v4 = vld [vmem:[#allocation5 + $0xc0] sm:$0xff] }
  0x35   :  { %2588 = vmatprep.subr.bf16.mxu1 %v3334_v35  ;;  %2684 = vmatprep.subr.bf16.mxu0 %v3334_v35  ;;  %4503 = vst [vmem:[#allocation21_spill] sm:$0xff] %v3392_v55  ;;  %v4414_v63 = vand.u32 4294901760, %v3384_v54  ;;  %v3413_v42 = vsub.f32 %v3258_v3, %v109_v7  ;;  %v3418_v1 = vsub.f32 %v3262_v6, %v113_v10  ;;  %v3430_v5 = vld [vmem:[#allocation5 + $0xd0] sm:$0xff]  ;;  %v3450_v10 = vld [vmem:[#allocation5 + $0xe8] sm:$0xff]  ;;  %v3477_v40 = vld [vmem:[#allocation5 + $0xe0] sm:$0xff] }
  0x36   :  { %v3426_v2 = vpack.c.bf16 %v4404_v51, %v4405_v50  ;;  %v3435_v3 = vsub.f32 %v3265_v8, %v115_v11  ;;  %v3440_v6 = vsub.f32 %v3267_v9, %v119_v12  ;;  %v3448_v7 = vpack.c.bf16 %v4406_v57, %v4407_v56  ;;  %v3452_v51 = vld [vmem:[#allocation5 + $0xf8] sm:$0xff]  ;;  %v44_v50 = vld [vmem:[#allocation2 + $0x8] sm:$0xff]  ;;  %v3479_v39 = vld [vmem:[#allocation5 + $0xf0] sm:$0xff] }
  0x37   :  { %4504 = vst [vmem:[#allocation22_spill] sm:$0xff] %v3413_v42  ;;  %4505 = vst [vmem:[#allocation23_spill] sm:$0xff] %v3418_v1  ;;  %v3457_v8 = vsub.f32 %v3272_v13, %v117_v24  ;;  %v3459_v9 = vand.u32 4294901760, %v43_v43  ;;  %v558_v11 = vand.u32 4294901760, %v3399_v58  ;;  %v570_v12 = vand.u32 4294901760, %v3404_v59  ;;  %v45_v0 = vld [vmem:[#allocation2 + $0x10] sm:$0xff] }
  0x38   :  { %2590 = vmatpush1.bf16.msra.mxu1 %v3346_v38  ;;  %2686 = vmatpush1.bf16.msra.mxu0 %v3346_v38  ;;  %4506 = vst [vmem:[#allocation24_spill] sm:$0xff] %v3426_v2  ;;  %4507 = vst [vmem:[#allocation25_spill] sm:$0xff] %v3448_v7  ;;  %v3467_v57 = vpack.c.bf16 %v4412_v61, %v4413_v60  ;;  %v3473_v56 = vpack.c.bf16 %v4414_v63, %v4415_v62  ;;  %v564_v62 = vand.u32 4294901760, %v3413_v42  ;;  %v46_v24 = vld [vmem:[#allocation2 + $0x18] sm:$0xff] }
  0x39   :  { %2592 = vmatprep.subr.bf16.mxu1 %v3356_v41  ;;  %2688 = vmatprep.subr.bf16.mxu0 %v3356_v41  ;;  %4508 = vst [vmem:[#allocation26_spill] sm:$0xff] %v3457_v8  ;;  %4509 = vst [vmem:[#allocation27_spill] sm:$0xff] %v3459_v9  ;;  %v3486_v63 = vsub.f32 %v43_v43, %v3459_v9  ;;  %v559_v32 = vsub.f32 %v3399_v58, %v558_v11  ;;  %v576_v29 = vand.u32 4294901760, %v3418_v1  ;;  %v48_v9 = vld [vmem:[#allocation2 + $0x28] sm:$0xff] }
  0x3a   :  { %4510 = vst [vmem:[#allocation28_spill] sm:$0xff] %v3467_v57  ;;  %4511 = vst [vmem:[#allocation29_spill] sm:$0xff] %v3473_v56  ;;  %v571_v31 = vsub.f32 %v3404_v59, %v570_v12  ;;  %v3494_v28 = vand.u32 4294901760, %v44_v50  ;;  %v3499_v27 = vsub.f32 %v3274_v14, %v121_v25  ;;  %v3503_v61 = vand.u32 4294901760, %v45_v0 }
  0x3b   :  { %4512 = vst [vmem:[#allocation30_spill] sm:$0xff] %v3486_v63  ;;  %v3508_v13 = vsub.f32 %v3276_v15, %v123_v26  ;;  %v4516_v14 = vand.u32 4294901760, %v3428_v4  ;;  %v4517_v25 = vand.u32 4294901760, %v3430_v5  ;;  %v4519_v15 = vand.u32 4294901760, %v3450_v10 }
  0x3c   :  { %2594 = vmatpush1.bf16.msra.mxu1 %v3376_v49  ;;  %2690 = vmatpush1.bf16.msra.mxu0 %v3376_v49  ;;  %4513 = vst [vmem:[#allocation31_spill] sm:$0xff] %v3494_v28  ;;  %4514 = vst [vmem:[#allocation32_spill] sm:$0xff] %v3503_v61  ;;  %v4520_v26 = vand.u32 4294901760, %v3452_v51  ;;  %v577_v49 = vsub.f32 %v3418_v1, %v576_v29  ;;  %v3533_v41 = vsub.f32 %v45_v0, %v3503_v61 }
  0x3d   :  { %2596 = vmatprep.subr.bf16.mxu1 %v3392_v55  ;;  %2692 = vmatprep.subr.bf16.mxu0 %v3392_v55  ;;  %v3513_v55 = vsub.f32 %v44_v50, %v3494_v28  ;;  %v3521_v60 = vpack.c.bf16 %v4517_v25, %v4516_v14  ;;  %v560_v50 = vand.u32 4294901760, %v559_v32  ;;  %v3535_v38 = vand.u32 4294901760, %v46_v24  ;;  %v47_v14 = vld [vmem:[#allocation2 + $0x20] sm:$0xff] }
  0x3e   :  { %v3527_v43 = vpack.c.bf16 %v4520_v26, %v4519_v15  ;;  %4522 = vst [vmem:[#allocation36_spill] sm:$0xff] %v3533_v41  ;;  %v4524_v25 = vand.u32 4294901760, %v3284_v17  ;;  %v4525_v15 = vand.u32 4294901760, %v3477_v40  ;;  %v4526_v26 = vand.u32 4294901760, %v3479_v39 }
  0x3f   :  { %4515 = vst [vmem:[#allocation33_spill] sm:$0xff] %v3513_v55  ;;  %4518 = vst [vmem:[#allocation34_spill] sm:$0xff] %v3521_v60  ;;  %v594_v28 = vand.u32 4294901760, %v3440_v6 }
  0x40   :  { %2598 = vmatpush1.bf16.msra.mxu1 %v3426_v2  ;;  %2694 = vmatpush1.bf16.msra.mxu0 %v3426_v2  ;;  %v565_v2 = vsub.f32 %v3413_v42, %v564_v62  ;;  %4521 = vst [vmem:[#allocation35_spill] sm:$0xff] %v3527_v43  ;;  %4523 = vst [vmem:[#allocation37_spill] sm:$0xff] %v3535_v38  ;;  %v3540_v35 = vsub.f32 %v3284_v17, %v4524_v25  ;;  %v578_v17 = vand.u32 4294901760, %v577_v49 }
  0x41   :  { %2600 = vmatprep.subr.bf16.mxu1 %v3448_v7  ;;  %2696 = vmatprep.subr.bf16.mxu0 %v3448_v7  ;;  %v206_v7 = vand.u32 4294901760, %v3486_v63  ;;  %v3546_v30 = vpack.c.bf16 %v4526_v26, %v4525_v15  ;;  %v3554_v25 = vand.u32 4294901760, %v47_v14  ;;  %v588_v26 = vand.u32 4294901760, %v3457_v8 }
  0x42   :  { %v566_v61 = vand.u32 4294901760, %v565_v2  ;;  %v4529_v49 = vand.u32 4294901760, %v3286_v18 }
  0x43   :  { %4527 = vst [vmem:[#allocation38_spill] sm:$0xff] %v3546_v30  ;;  %v207_v0 = vsub.f32 %v3486_v63, %v206_v7 }
  0x44   :  { %2602 = vmatpush1.bf16.msra.mxu1 %v3467_v57  ;;  %2698 = vmatpush1.bf16.msra.mxu0 %v3467_v57  ;;  %v572_v57 = vand.u32 4294901760, %v571_v31  ;;  %v582_v31 = vand.u32 4294901760, %v3435_v3  ;;  %v3568_v63 = vsub.f32 %v3286_v18, %v4529_v49  ;;  %v2613_v18 = vpack.c.bf16 %v578_v17, %v566_v61  ;;  %v49_v61 = vld [vmem:[#allocation2 + $0x30] sm:$0xff] }
  0x45   :  { %2604 = vmatprep.subr.bf16.mxu1 %v3473_v56  ;;  %2700 = vmatprep.subr.bf16.mxu0 %v3473_v56  ;;  %v2707_v56 = vpack.c.bf16 %v570_v12, %v558_v11  ;;  %v3562_v11 = vsub.f32 %v46_v24, %v3535_v38  ;;  %v595_v12 = vsub.f32 %v3440_v6, %v594_v28  ;;  %v208_v24 = vand.u32 4294901760, %v207_v0 }
  0x46   :  { %v583_v15 = vsub.f32 %v3435_v3, %v582_v31  ;;  %v2611_v32 = vpack.c.bf16 %v572_v57, %v560_v50  ;;  %v4531_v57 = vand.u32 4294901760, %v3288_v19  ;;  %v600_v38 = vand.u32 4294901760, %v3499_v27 }
  0x47   :  { %4528 = vst [vmem:[#allocation39_spill] sm:$0xff] %v3562_v11  ;;  %v596_v2 = vand.u32 4294901760, %v595_v12  ;;  %v2709_v49 = vpack.c.bf16 %v576_v29, %v564_v62  ;;  %v239_v0 = vand.u32 4294901760, %v3562_v11  ;;  %v618_v62 = vand.u32 4294901760, %v3540_v35 }
  0x48   :  { %2606 = vmatpush1.bf16.msra.mxu1 %v3521_v60  ;;  %2702 = vmatpush1.bf16.msra.mxu0 %v3521_v60  ;;  %v4530_v60 = vand.u32 4294901760, %v3513_v55  ;;  %v584_v20 = vand.u32 4294901760, %v583_v15  ;;  %v3577_v50 = vsub.f32 %v3288_v19, %v4531_v57  ;;  %v4533_v15 = vand.u32 4294901760, %v3533_v41 }
  0x49   :  { %2608 = vmatprep.subr.bf16.mxu1 %v3527_v43  ;;  %2704 = vmatprep.subr.bf16.mxu0 %v3527_v43  ;;  %v589_v43 = vsub.f32 %v3457_v8, %v588_v26  ;;  %v601_v57 = vsub.f32 %v3499_v27, %v600_v38  ;;  %v2711_v8 = vpack.c.bf16 %v594_v28, %v582_v31  ;;  %v4536_v31 = vmov 0.0  }
  0x4a   :  { %v218_v21 = vsub.f32 %v3513_v55, %v4530_v60  ;;  %v3583_v60 = vsub.f32 %v47_v14, %v3554_v25  ;;  %v229_v19 = vsub.f32 %v3533_v41, %v4533_v15  ;;  %v2615_v42 = vpack.c.bf16 %v596_v2, %v584_v20  ;;  %v50_v2 = vld [vmem:[#allocation2 + $0x38] sm:$0xff] }
  0x4b   :  { %v590_v12 = vand.u32 4294901760, %v589_v43  ;;  %v602_v29 = vand.u32 4294901760, %v601_v57  ;;  %v612_v14 = vand.u32 4294901760, %v3568_v63  ;;  %v4535_v20 = vand.u32 4294901760, %v3304_v23 }
  0x4c   :  { %2610 = vmatpush1.bf16.msra.mxu1 %v3546_v30  ;;  %2706 = vmatpush1.bf16.msra.mxu0 %v3546_v30  ;;  %4532 = vst [vmem:[#allocation40_spill] sm:$0xff] %v3583_v60  ;;  %v219_v1 = vand.u32 4294901760, %v218_v21  ;;  %v3590_v30 = vand.u32 4294901760, %v48_v9  ;;  %v4449_v28 = vand.u32 4294901760, %v3583_v60  ;;  %v624_v15 = vand.u32 4294901760, %v3577_v50 }
  0x4d   :  { %2612 = vmatprep.subr.bf16.mxu1 %v2611_v32  ;;  %2708 = vmatprep.subr.bf16.mxu0 %v2707_v56  ;;  %v606_v56 = vand.u32 4294901760, %v3508_v13  ;;  %v4534_v32 = vand.u32 4294901760, %v3302_v22  ;;  %v3603_v21 = vsub.f32 %v3304_v23, %v4535_v20  ;;  %v2617_v17 = vpack.c.bf16 %v602_v29, %v590_v12 }
  0x4e   :  { %v230_v57 = vand.u32 4294901760, %v229_v19  ;;  %v240_v23 = vsub.f32 %v3562_v11, %v239_v0  ;;  %v613_v19 = vsub.f32 %v3568_v63, %v612_v14 }
  0x4f   :  { %209 = vmatmul.mubr.f32.vlgmr.msra.gmra.mrb[0].mxu1 %v208_v24  ;;  %1490 = vmatmul.mubr.f32.vlgmr.msra.gmra.mrb[0].mxu0 %v206_v7  ;;  %v3598_v43 = vsub.f32 %v3302_v22, %v4534_v32  ;;  %v2713_v7 = vpack.c.bf16 %v600_v38, %v588_v26  ;;  %v607_v24 = vsub.f32 %v3508_v13, %v606_v56  ;;  %v3617_v26 = vand.u32 4294901760, %v49_v61 }
  0x50   :  { %2614 = vmatpush1.bf16.msra.mxu1 %v2613_v18  ;;  %2710 = vmatpush1.bf16.msra.mxu0 %v2709_v49  ;;  %v619_v22 = vsub.f32 %v3540_v35, %v618_v62  ;;  %v3615_v38 = vsub.f32 %v48_v9, %v3590_v30  ;;  %v4538_v18 = vand.u32 4294901760, %v3513_v55  ;;  %v2715_v29 = vpack.c.bf16 %v618_v62, %v606_v56 }
  0x51   :  { %214 = vmatprep.mubr.f32.mxu1 %v4536_v31  ;;  %1495 = vmatprep.mubr.f32.mxu0 %v4536_v31  ;;  %v608_v49 = vand.u32 4294901760, %v607_v24  ;;  %v4539_v32 = vand.u32 4294901760, %v3326_v33  ;;  %v614_v56 = vand.u32 4294901760, %v613_v19  ;;  %v625_v62 = vsub.f32 %v3577_v50, %v624_v15 }
  0x52   :  { %2616 = vmatprep.subr.bf16.mxu1 %v2615_v42  ;;  %2712 = vmatprep.subr.bf16.mxu0 %v2711_v8  ;;  %4537 = vst [vmem:[#allocation41_spill] sm:$0xff] %v3615_v38  ;;  %v620_v12 = vand.u32 4294901760, %v619_v22  ;;  %v4540_v42 = vand.u32 4294901760, %v3328_v34  ;;  %v2717_v24 = vpack.c.bf16 %v624_v15, %v612_v14  ;;  %v251_v22 = vsub.f32 %v3583_v60, %v4449_v28 }
  0x53   :  { %220 = vmatmul.mubr.f32.gmra.mrb[2].mxu1 %v219_v1  ;;  %1499 = vmatmul.mubr.f32.gmra.mrb[2].mxu0 %v4538_v18  ;;  %v3625_v20 = vsub.f32 %v3326_v33, %v4539_v32  ;;  %v3634_v1 = vand.u32 4294901760, %v50_v2  ;;  %v241_v33 = vand.u32 4294901760, %v240_v23  ;;  %v4542_v18 = vand.u32 4294901760, %v3533_v41 }
  0x54   :  { %v3630_v8 = vsub.f32 %v3328_v34, %v4540_v42  ;;  %225 = vmatprep.mubr.f32.mxu1 %v4536_v31  ;;  %1504 = vmatprep.mubr.f32.mxu0 %v4536_v31  ;;  %v2619_v9 = vpack.c.bf16 %v620_v12, %v608_v49  ;;  %v3641_v34 = vsub.f32 %v49_v61, %v3617_v26  ;;  %v626_v49 = vand.u32 4294901760, %v625_v62 }
  0x55   :  { %2618 = vmatpush1.bf16.msra.mxu1 %v2617_v17  ;;  %2714 = vmatpush1.bf16.msra.mxu0 %v2713_v7  ;;  %v261_v7 = vand.u32 4294901760, %v3615_v38  ;;  %v51_v17 = vld [vmem:[#allocation2 + $0x40] sm:$0xff]  ;;  %v630_v12 = vand.u32 4294901760, %v3598_v43  ;;  %v642_v14 = vand.u32 4294901760, %v3603_v21  ;;  %v636_v61 = vand.u32 4294901760, %v3625_v20 }
  0x56   :  { %4541 = vst [vmem:[#allocation42_spill] sm:$0xff] %v3641_v34  ;;  %2716 = vmatprep.subr.bf16.mxu0 %v2715_v29  ;;  %v3652_v15 = vsub.f32 %v50_v2, %v3634_v1  ;;  %2620 = vmatprep.subr.bf16.mxu1 %v2619_v9  ;;  %v648_v29 = vand.u32 4294901760, %v3630_v8  ;;  %v252_v19 = vand.u32 4294901760, %v251_v22  ;;  %v3657_v42 = vand.u32 4294901760, %v51_v17 }
  0x57   :  { %231 = vmatmul.mubr.f32.gmra.mrb[4].mxu1 %v230_v57  ;;  %1508 = vmatmul.mubr.f32.gmra.mrb[4].mxu0 %v4542_v18  ;;  %v2621_v57 = vpack.c.bf16 %v626_v49, %v614_v56  ;;  %v631_v23 = vsub.f32 %v3598_v43, %v630_v12  ;;  %v643_v62 = vsub.f32 %v3603_v21, %v642_v14  ;;  %v4545_v18 = vand.u32 4294901760, %v3336_v36 }
  0x58   :  { %236 = vmatprep.mubr.f32.mxu1 %v4536_v31  ;;  %1513 = vmatprep.mubr.f32.mxu0 %v4536_v31  ;;  %4543 = vst [vmem:[#allocation43_spill] sm:$0xff] %v3652_v15  ;;  %4544 = vst [vmem:[#allocation44_spill] sm:$0xff] %v3657_v42  ;;  %v262_v2 = vsub.f32 %v3615_v38, %v261_v7  ;;  %v2719_v56 = vpack.c.bf16 %v642_v14, %v630_v12  ;;  %v4546_v49 = vand.u32 4294901760, %v3338_v37  ;;  %v52_v12 = vld [vmem:[#allocation2 + $0x48] sm:$0xff] }
  0x59   :  { %2718 = vmatpush1.bf16.msra.mxu0 %v2717_v24  ;;  %v632_v9 = vand.u32 4294901760, %v631_v23  ;;  %v637_v24 = vsub.f32 %v3625_v20, %v636_v61  ;;  %v3667_v22 = vsub.f32 %v3336_v36, %v4545_v18  ;;  %v644_v14 = vand.u32 4294901760, %v643_v62  ;;  %2622 = vmatpush1.bf16.msra.mxu1 %v2621_v57  ;;  %v53_v57 = vld [vmem:[#allocation2 + $0x50] sm:$0xff] }
  0x5a   :  { %v3672_v32 = vsub.f32 %v3338_v37, %v4546_v49  ;;  %2720 = vmatprep.subr.bf16.mxu0 %v2719_v56  ;;  %v649_v18 = vsub.f32 %v3630_v8, %v648_v29  ;;  %v2721_v37 = vpack.c.bf16 %v648_v29, %v636_v61  ;;  %v3684_v49 = vsub.f32 %v51_v17, %v3657_v42 }
  0x5b   :  { %242 = vmatmul.mubr.f32.gmra.mrb[6].mxu1 %v241_v33  ;;  %1517 = vmatmul.mubr.f32.gmra.mrb[6].mxu0 %v239_v0  ;;  %v4547_v33 = vand.u32 4294901760, %v3360_v44  ;;  %v638_v36 = vand.u32 4294901760, %v637_v24  ;;  %v2623_v28 = vpack.c.bf16 %v644_v14, %v632_v9  ;;  %v4550_v38 = vand.u32 4294901760, %v3641_v34 }
  0x5c   :  { %247 = vmatprep.mubr.f32.mxu1 %v4536_v31  ;;  %1522 = vmatprep.mubr.f32.mxu0 %v4536_v31  ;;  %4548 = vst [vmem:[#allocation45_spill] sm:$0xff] %v3684_v49  ;;  %v3691_v23 = vand.u32 4294901760, %v52_v12  ;;  %v650_v56 = vand.u32 4294901760, %v649_v18  ;;  %v654_v17 = vand.u32 4294901760, %v3667_v22  ;;  %v666_v61 = vand.u32 4294901760, %v3672_v32 }
  0x5d   :  { %v3677_v0 = vsub.f32 %v3360_v44, %v4547_v33  ;;  %v4549_v44 = vand.u32 4294901760, %v3583_v60  ;;  %v263_v33 = vand.u32 4294901760, %v262_v2  ;;  %v273_v62 = vsub.f32 %v3641_v34, %v4550_v38  ;;  %2624 = vmatprep.subr.bf16.mxu1 %v2623_v28  ;;  %2722 = vmatpush1.bf16.msra.mxu0 %v2721_v37 }
  0x5e   :  { %4551 = vst [vmem:[#allocation46_spill] sm:$0xff] %v3691_v23  ;;  %v4552_v29 = vand.u32 4294901760, %v3362_v45  ;;  %v4553_v2 = vand.u32 4294901760, %v3652_v15  ;;  %v2625_v9 = vpack.c.bf16 %v650_v56, %v638_v36  ;;  %v3707_v18 = vand.u32 4294901760, %v53_v57 }
  0x5f   :  { %253 = vmatmul.mubr.f32.gmra.mrb[8].mxu1 %v252_v19  ;;  %1526 = vmatmul.mubr.f32.gmra.mrb[8].mxu0 %v4549_v44  ;;  %v660_v24 = vand.u32 4294901760, %v3677_v0  ;;  %v655_v44 = vsub.f32 %v3667_v22, %v654_v17  ;;  %v667_v60 = vsub.f32 %v3672_v32, %v666_v61  ;;  %v2723_v28 = vpack.c.bf16 %v666_v61, %v654_v17 }
  0x60   :  { %258 = vmatprep.mubr.f32.mxu1 %v4536_v31  ;;  %1531 = vmatprep.mubr.f32.mxu0 %v4536_v31  ;;  %v3700_v19 = vsub.f32 %v3362_v45, %v4552_v29  ;;  %v284_v38 = vsub.f32 %v3652_v15, %v4553_v2  ;;  %4554 = vst [vmem:[#allocation47_spill] sm:$0xff] %v3707_v18  ;;  %v274_v45 = vand.u32 4294901760, %v273_v62  ;;  %v54_v2 = vld [vmem:[#allocation2 + $0x58] sm:$0xff]  ;;  %v4556_v37 = vand.u32 4294901760, %v3364_v46 }
  0x61   :  { %v3712_v29 = vsub.f32 %v52_v12, %v3691_v23  ;;  %v661_v36 = vsub.f32 %v3677_v0, %v660_v24  ;;  %v4557_v14 = vand.u32 4294901760, %v3366_v47  ;;  %v668_v12 = vand.u32 4294901760, %v667_v60  ;;  %2626 = vmatpush1.bf16.msra.mxu1 %v2625_v9  ;;  %2724 = vmatprep.subr.bf16.mxu0 %v2723_v28 }
  0x62   :  { %v3718_v56 = vsub.f32 %v3364_v46, %v4556_v37  ;;  %v4559_v17 = vand.u32 4294901760, %v3380_v52  ;;  %v285_v61 = vand.u32 4294901760, %v284_v38  ;;  %v3742_v60 = vsub.f32 %v53_v57, %v3707_v18 }
  0x63   :  { %264 = vmatmul.mubr.f32.gmra.mrb[10].mxu1 %v263_v33  ;;  %1535 = vmatmul.mubr.f32.gmra.mrb[10].mxu0 %v261_v7  ;;  %4555 = vst [vmem:[#allocation48_spill] sm:$0xff] %v3712_v29  ;;  %v3723_v11 = vsub.f32 %v3366_v47, %v4557_v14  ;;  %v656_v7 = vand.u32 4294901760, %v655_v44  ;;  %v4558_v33 = vand.u32 4294901760, %v3368_v48  ;;  %v672_v47 = vand.u32 4294901760, %v3700_v19 }
  0x64   :  { %269 = vmatprep.mubr.f32.mxu1 %v4536_v31  ;;  %1540 = vmatprep.mubr.f32.mxu0 %v4536_v31  ;;  %v3735_v46 = vsub.f32 %v3380_v52, %v4559_v17  ;;  %v4560_v14 = vand.u32 4294901760, %v3684_v49  ;;  %4561 = vst [vmem:[#allocation49_spill] sm:$0xff] %v3742_v60  ;;  %v3744_v37 = vand.u32 4294901760, %v54_v2  ;;  %v4563_v52 = vand.u32 4294901760, %v3641_v34 }
  0x65   :  { %v3730_v62 = vsub.f32 %v3368_v48, %v4558_v33  ;;  %v55_v48 = vld [vmem:[#allocation2 + $0x60] sm:$0xff]  ;;  %v2627_v33 = vpack.c.bf16 %v668_v12, %v656_v7  ;;  %v305_v38 = vand.u32 4294901760, %v3712_v29  ;;  %v662_v9 = vand.u32 4294901760, %v661_v36 }
  0x66   :  { %v295_v44 = vsub.f32 %v3684_v49, %v4560_v14  ;;  %4562 = vst [vmem:[#allocation50_spill] sm:$0xff] %v3744_v37  ;;  %v673_v28 = vsub.f32 %v3700_v19, %v672_v47  ;;  %v2725_v17 = vpack.c.bf16 %v672_v47, %v660_v24  ;;  %v4564_v57 = vand.u32 4294901760, %v3382_v53 }
  0x67   :  { %275 = vmatmul.mubr.f32.gmra.mrb[12].mxu1 %v274_v45  ;;  %1544 = vmatmul.mubr.f32.gmra.mrb[12].mxu0 %v4563_v52  ;;  %v3757_v7 = vand.u32 4294901760, %v55_v48  ;;  %v678_v12 = vand.u32 4294901760, %v3718_v56  ;;  %v3762_v24 = vsub.f32 %v54_v2, %v3744_v37  ;;  %v690_v47 = vand.u32 4294901760, %v3723_v11  ;;  %v56_v2 = vld [vmem:[#allocation2 + $0x68] sm:$0xff] }
  0x68   :  { %280 = vmatprep.mubr.f32.mxu1 %v4536_v31  ;;  %1549 = vmatprep.mubr.f32.mxu0 %v4536_v31  ;;  %v3755_v14 = vsub.f32 %v3382_v53, %v4564_v57  ;;  %v674_v45 = vand.u32 4294901760, %v673_v28  ;;  %v684_v52 = vand.u32 4294901760, %v3730_v62  ;;  %v4567_v53 = vand.u32 4294901760, %v3652_v15 }
  0x69   :  { %4565 = vst [vmem:[#allocation51_spill] sm:$0xff] %v3757_v7  ;;  %2628 = vmatprep.subr.bf16.mxu1 %v2627_v33  ;;  %2726 = vmatpush1.bf16.msra.mxu0 %v2725_v17  ;;  %4566 = vst [vmem:[#allocation52_spill] sm:$0xff] %v3762_v24  ;;  %v296_v57 = vand.u32 4294901760, %v295_v44  ;;  %v306_v33 = vsub.f32 %v3712_v29, %v305_v38  ;;  %v696_v17 = vand.u32 4294901760, %v3735_v46  ;;  %v4568_v34 = vand.u32 4294901760, %v3384_v54 }
  0x6a   :  { %v2629_v28 = vpack.c.bf16 %v674_v45, %v662_v9  ;;  %v4569_v44 = vand.u32 4294901760, %v3428_v4  ;;  %v3785_v45 = vsub.f32 %v55_v48, %v3757_v7  ;;  %v4571_v29 = vand.u32 4294901760, %v3742_v60  ;;  %v57_v48 = vld [vmem:[#allocation2 + $0x70] sm:$0xff] }
  0x6b   :  { %286 = vmatmul.mubr.f32.gmra.mrb[14].mxu1 %v285_v61  ;;  %1553 = vmatmul.mubr.f32.gmra.mrb[14].mxu0 %v4567_v53  ;;  %v3773_v36 = vsub.f32 %v3384_v54, %v4568_v34  ;;  %v679_v61 = vsub.f32 %v3718_v56, %v678_v12  ;;  %v691_v53 = vsub.f32 %v3723_v11, %v690_v47  ;;  %v4463_v41 = vand.u32 4294901760, %v3762_v24 }
  0x6c   :  { %291 = vmatprep.mubr.f32.mxu1 %v4536_v31  ;;  %1558 = vmatprep.mubr.f32.mxu0 %v4536_v31  ;;  %v3782_v9 = vsub.f32 %v3428_v4, %v4569_v44  ;;  %4570 = vst [vmem:[#allocation53_spill] sm:$0xff] %v3785_v45  ;;  %v2727_v54 = vpack.c.bf16 %v690_v47, %v678_v12  ;;  %v4572_v18 = vand.u32 4294901760, %v3684_v49  ;;  %v307_v4 = vand.u32 4294901760, %v306_v33 }
  0x6d   :  { %2630 = vmatpush1.bf16.msra.mxu1 %v2629_v28  ;;  %v685_v34 = vsub.f32 %v3730_v62, %v684_v52  ;;  %v317_v15 = vsub.f32 %v3742_v60, %v4571_v29  ;;  %v680_v55 = vand.u32 4294901760, %v679_v61  ;;  %v692_v37 = vand.u32 4294901760, %v691_v53 }
  0x6e   :  { %v3794_v44 = vand.u32 4294901760, %v56_v2  ;;  %v697_v12 = vsub.f32 %v3735_v46, %v696_v17  ;;  %v2729_v47 = vpack.c.bf16 %v696_v17, %v684_v52  ;;  %v4574_v61 = vand.u32 4294901760, %v3430_v5  ;;  %2728 = vmatprep.subr.bf16.mxu0 %v2727_v54 }
  0x6f   :  { %297 = vmatmul.mubr.f32.gmra.mrb[16].mxu1 %v296_v57  ;;  %1562 = vmatmul.mubr.f32.gmra.mrb[16].mxu0 %v4572_v18  ;;  %v686_v28 = vand.u32 4294901760, %v685_v34  ;;  %v2631_v29 = vpack.c.bf16 %v692_v37, %v680_v55  ;;  %v4466_v18 = vand.u32 4294901760, %v3785_v45  ;;  %v318_v53 = vand.u32 4294901760, %v317_v15  ;;  %v58_v37 = vld [vmem:[#allocation2 + $0x78] sm:$0xff] }
  0x70   :  { %4573 = vst [vmem:[#allocation54_spill] sm:$0xff] %v3794_v44  ;;  %302 = vmatprep.mubr.f32.mxu1 %v4536_v31  ;;  %1567 = vmatprep.mubr.f32.mxu0 %v4536_v31  ;;  %v3802_v57 = vsub.f32 %v3430_v5, %v4574_v61  ;;  %v698_v33 = vand.u32 4294901760, %v697_v12  ;;  %v328_v34 = vsub.f32 %v3762_v24, %v4463_v41  ;;  %v3808_v49 = vand.u32 4294901760, %v57_v48 }
  0x71   :  { %2632 = vmatprep.subr.bf16.mxu1 %v2631_v29  ;;  %2730 = vmatpush1.bf16.msra.mxu0 %v2729_v47  ;;  %v702_v55 = vand.u32 4294901760, %v3755_v14  ;;  %v3812_v5 = vsub.f32 %v56_v2, %v3794_v44  ;;  %v714_v17 = vand.u32 4294901760, %v3773_v36  ;;  %v708_v15 = vand.u32 4294901760, %v3782_v9 }
  0x72   :  { %4575 = vst [vmem:[#allocation55_spill] sm:$0xff] %v3808_v49  ;;  %v2633_v52 = vpack.c.bf16 %v698_v33, %v686_v28  ;;  %v4577_v12 = vand.u32 4294901760, %v3450_v10  ;;  %v329_v47 = vand.u32 4294901760, %v328_v34  ;;  %v339_v61 = vsub.f32 %v3785_v45, %v4466_v18 }
  0x73   :  { %308 = vmatmul.mubr.f32.gmra.mrb[18].mxu1 %v307_v4  ;;  %1571 = vmatmul.mubr.f32.gmra.mrb[18].mxu0 %v305_v38  ;;  %4576 = vst [vmem:[#allocation56_spill] sm:$0xff] %v3812_v5  ;;  %v703_v54 = vsub.f32 %v3755_v14, %v702_v55  ;;  %v59_v38 = vld [vmem:[#allocation2 + $0x80] sm:$0xff]  ;;  %v715_v2 = vsub.f32 %v3773_v36, %v714_v17  ;;  %v3829_v33 = vand.u32 4294901760, %v58_v37  ;;  %v4579_v44 = vand.u32 4294901760, %v3742_v60 }
  0x74   :  { %313 = vmatprep.mubr.f32.mxu1 %v4536_v31  ;;  %1576 = vmatprep.mubr.f32.mxu0 %v4536_v31  ;;  %v3822_v4 = vsub.f32 %v3450_v10, %v4577_v12  ;;  %v2731_v28 = vpack.c.bf16 %v714_v17, %v702_v55  ;;  %v709_v29 = vsub.f32 %v3782_v9, %v708_v15  ;;  %v349_v10 = vand.u32 4294901760, %v3812_v5 }
  0x75   :  { %2634 = vmatpush1.bf16.msra.mxu1 %v2633_v52  ;;  %4578 = vst [vmem:[#allocation57_spill] sm:$0xff] %v3829_v33  ;;  %v704_v41 = vand.u32 4294901760, %v703_v54  ;;  %v3835_v52 = vsub.f32 %v57_v48, %v3808_v49  ;;  %v716_v55 = vand.u32 4294901760, %v715_v2  ;;  %v720_v17 = vand.u32 4294901760, %v3802_v57 }
  0x76   :  { %v4581_v34 = vand.u32 4294901760, %v3452_v51  ;;  %v4582_v18 = vand.u32 4294901760, %v3477_v40  ;;  %v3855_v48 = vand.u32 4294901760, %v59_v38  ;;  %2732 = vmatprep.subr.bf16.mxu0 %v2731_v28  ;;  %v340_v49 = vand.u32 4294901760, %v339_v61 }
  0x77   :  { %319 = vmatmul.mubr.f32.gmra.mrb[20].mxu1 %v318_v53  ;;  %1580 = vmatmul.mubr.f32.gmra.mrb[20].mxu0 %v4579_v44  ;;  %4580 = vst [vmem:[#allocation58_spill] sm:$0xff] %v3835_v52  ;;  %v4583_v44 = vand.u32 4294901760, %v3479_v39  ;;  %v2635_v2 = vpack.c.bf16 %v716_v55, %v704_v41  ;;  %v2733_v60 = vpack.c.bf16 %v720_v17, %v708_v15  ;;  %v360_v7 = vand.u32 4294901760, %v3835_v52 }
  0x78   :  { %v3841_v12 = vsub.f32 %v3452_v51, %v4581_v34  ;;  %v3846_v53 = vsub.f32 %v3477_v40, %v4582_v18  ;;  %324 = vmatprep.mubr.f32.mxu1 %v4536_v31  ;;  %1585 = vmatprep.mubr.f32.mxu0 %v4536_v31  ;;  %4584 = vst [vmem:[#allocation59_spill] sm:$0xff] %v3855_v48  ;;  %v710_v51 = vand.u32 4294901760, %v709_v29  ;;  %v60_v18 = vld [vmem:[#allocation2 + $0x88] sm:$0xff]  ;;  %v726_v41 = vand.u32 4294901760, %v3822_v4 }
  0x79   :  { %v3851_v54 = vsub.f32 %v3479_v39, %v4583_v44  ;;  %v721_v34 = vsub.f32 %v3802_v57, %v720_v17  ;;  %v3859_v40 = vsub.f32 %v58_v37, %v3829_v33  ;;  %v4585_v39 = vand.u32 4294901760, %v3762_v24  ;;  %2636 = vmatprep.subr.bf16.mxu1 %v2635_v2  ;;  %2734 = vmatpush1.bf16.msra.mxu0 %v2733_v60  ;;  %v61_v24 = vld [vmem:[#allocation2 + $0x90] sm:$0xff] }
  0x7a   :  { %v350_v44 = vsub.f32 %v3812_v5, %v349_v10  ;;  %v3869_v15 = vsub.f32 %v59_v38, %v3855_v48  ;;  %v738_v37 = vand.u32 4294901760, %v3841_v12  ;;  %v732_v28 = vand.u32 4294901760, %v3846_v53 }
  0x7b   :  { %330 = vmatmul.mubr.f32.gmra.mrb[22].mxu1 %v329_v47  ;;  %1589 = vmatmul.mubr.f32.gmra.mrb[22].mxu0 %v4585_v39  ;;  %v722_v23 = vand.u32 4294901760, %v721_v34  ;;  %v3873_v29 = vand.u32 4294901760, %v60_v18  ;;  %v744_v61 = vand.u32 4294901760, %v3851_v54  ;;  %v371_v55 = vand.u32 4294901760, %v3859_v40 }
  0x7c   :  { %335 = vmatprep.mubr.f32.mxu1 %v4536_v31  ;;  %1594 = vmatprep.mubr.f32.mxu0 %v4536_v31  ;;  %4586 = vst [vmem:[#allocation60_spill] sm:$0xff] %v3869_v15  ;;  %v727_v17 = vsub.f32 %v3822_v4, %v726_v41  ;;  %v739_v34 = vsub.f32 %v3841_v12, %v738_v37  ;;  %v4587_v38 = vand.u32 4294901760, %v3785_v45  ;;  %v351_v39 = vand.u32 4294901760, %v350_v44 }
  0x7d   :  { %v2637_v47 = vpack.c.bf16 %v722_v23, %v710_v51  ;;  %v361_v5 = vsub.f32 %v3835_v52, %v360_v7  ;;  %v2735_v48 = vpack.c.bf16 %v738_v37, %v726_v41  ;;  %v733_v23 = vsub.f32 %v3846_v53, %v732_v28  ;;  %v62_v41 = vld [vmem:[#allocation2 + $0x98] sm:$0xff] }
  0x7e   :  { %v382_v60 = vand.u32 4294901760, %v3869_v15  ;;  %v728_v2 = vand.u32 4294901760, %v727_v17  ;;  %v740_v51 = vand.u32 4294901760, %v739_v34  ;;  %v3890_v52 = vand.u32 4294901760, %v61_v24 }
  0x7f   :  { %341 = vmatmul.mubr.f32.gmra.mrb[24].mxu1 %v340_v49  ;;  %1598 = vmatmul.mubr.f32.gmra.mrb[24].mxu0 %v4587_v38  ;;  %v3887_v49 = vsub.f32 %v60_v18, %v3873_v29  ;;  %v734_v44 = vand.u32 4294901760, %v733_v23  ;;  %v745_v38 = vsub.f32 %v3851_v54, %v744_v61  ;;  %v2737_v45 = vpack.c.bf16 %v744_v61, %v732_v28  ;;  %v4590_v61 = vld [vmem:[#allocation26_spill] sm:$0xff]  ;;  %v68_v23 = vld [vmem:[#allocation2 + $0xc8] sm:$0xff] }
  0x80   :  { %346 = vmatprep.mubr.f32.mxu1 %v4536_v31  ;;  %1603 = vmatprep.mubr.f32.mxu0 %v4536_v31  ;;  %v2639_v37 = vpack.c.bf16 %v740_v51, %v728_v2  ;;  %v362_v33 = vand.u32 4294901760, %v361_v5  ;;  %v372_v42 = vsub.f32 %v3859_v40, %v371_v55  ;;  %v3902_v5 = vsub.f32 %v61_v24, %v3890_v52  ;;  %v63_v2 = vld [vmem:[#allocation2 + $0xa0] sm:$0xff] }
  0x81   :  { %4588 = vst [vmem:[#allocation61_spill] sm:$0xff] %v3887_v49  ;;  %2638 = vmatpush1.bf16.msra.mxu1 %v2637_v47  ;;  %2736 = vmatprep.subr.bf16.mxu0 %v2735_v48  ;;  %v746_v17 = vand.u32 4294901760, %v745_v38  ;;  %v383_v48 = vsub.f32 %v3869_v15, %v382_v60  ;;  %v393_v18 = vand.u32 4294901760, %v3887_v49  ;;  %v3897_v47 = vand.u32 4294901760, %v62_v41 }
  0x82   :  { %2640 = vmatprep.subr.bf16.mxu1 %v2639_v37  ;;  %2738 = vmatpush1.bf16.msra.mxu0 %v2737_v45  ;;  %4589 = vst [vmem:[#allocation62_spill] sm:$0xff] %v3902_v5  ;;  %v2643_v28 = vpack.c.bf16 %v3404_v59, %v3399_v58  ;;  %v373_v45 = vand.u32 4294901760, %v372_v42  ;;  %v3923_v42 = vand.u32 4294901760, %v63_v2 }
  0x83   :  { %352 = vmatmul.mubr.f32.gmra.mrb[26].mxu1 %v351_v39  ;;  %1607 = vmatmul.mubr.f32.gmra.mrb[26].mxu0 %v349_v10  ;;  %v2641_v34 = vpack.c.bf16 %v746_v17, %v734_v44  ;;  %v3921_v59 = vsub.f32 %v62_v41, %v3897_v47  ;;  %v64_v44 = vld [vmem:[#allocation2 + $0xa8] sm:$0xff] }
  0x84   :  { %357 = vmatprep.mubr.f32.mxu1 %v4536_v31  ;;  %1612 = vmatprep.mubr.f32.mxu0 %v4536_v31  ;;  %v3930_v17 = vsub.f32 %v63_v2, %v3923_v42 }
  0x85   :  { %2740 = vmatprep.subr.bf16.mxu0 %v3282_v16  ;;  %2642 = vmatpush1.bf16.msra.mxu1 %v2641_v34  ;;  %v394_v16 = vsub.f32 %v3887_v49, %v393_v18  ;;  %4591 = vst [vmem:[#allocation26_spill] sm:$0xff] %v3921_v59  ;;  %v415_v37 = vand.u32 4294901760, %v3921_v59  ;;  %v3933_v34 = vand.u32 4294901760, %v64_v44 }
  0x86   :  { %2644 = vmatprep.subr.bf16.mxu1 %v2643_v28  ;;  %4592 = vst [vmem:[#allocation63_spill] sm:$0xff] %v3930_v17  ;;  %v65_v28 = vld [vmem:[#allocation2 + $0xb0] sm:$0xff] }
  0x87   :  { %363 = vmatmul.mubr.f32.gmra.mrb[28].mxu1 %v362_v33  ;;  %1616 = vmatmul.mubr.f32.gmra.mrb[28].mxu0 %v360_v7  ;;  %v384_v7 = vand.u32 4294901760, %v383_v48  ;;  %v404_v33 = vand.u32 4294901760, %v3902_v5  ;;  %v395_v38 = vand.u32 4294901760, %v394_v16  ;;  %v416_v2 = vsub.f32 %v3921_v59, %v415_v37 }
  0x88   :  { %368 = vmatprep.mubr.f32.mxu1 %v4536_v31  ;;  %1621 = vmatprep.mubr.f32.mxu0 %v4536_v31  ;;  %v3944_v16 = vsub.f32 %v64_v44, %v3933_v34  ;;  %v67_v44 = vld [vmem:[#allocation2 + $0xc0] sm:$0xff] }
  0x89   :  { %v405_v41 = vsub.f32 %v3902_v5, %v404_v33  ;;  %v417_v58 = vand.u32 4294901760, %v416_v2  ;;  %v3962_v51 = vand.u32 4294901760, %v67_v44 }
  0x8a   :  { %4593 = vst [vmem:[#allocation64_spill] sm:$0xff] %v3944_v16 }
  0x8b   :  { %374 = vmatmul.mubr.f32.gmra.mrb[30].mxu1 %v373_v45  ;;  %1625 = vmatmul.mubr.f32.gmra.mrb[30].mxu0 %v371_v55  ;;  %v426_v45 = vand.u32 4294901760, %v3930_v17  ;;  %v66_v55 = vld [vmem:[#allocation2 + $0xb8] sm:$0xff]  ;;  %v3970_v39 = vsub.f32 %v67_v44, %v3962_v51 }
  0x8c   :  { %379 = vmatprep.mubr.f32.mxu1 %v4536_v31  ;;  %1630 = vmatprep.mubr.f32.mxu0 %v4536_v31  ;;  %v3950_v48 = vand.u32 4294901760, %v66_v55 }
  0x8d   :  { %4596 = vst [vmem:[#allocation67_spill] sm:$0xff] %v3970_v39 }
  0x8e   :  { %v3960_v24 = vsub.f32 %v66_v55, %v3950_v48  ;;  %v3972_v55 = vand.u32 4294901760, %v68_v23 }
  0x8f   :  { %385 = vmatmul.mubr.f32.gmra.mrb[32].mxu1 %v384_v7  ;;  %1634 = vmatmul.mubr.f32.gmra.mrb[32].mxu0 %v382_v60  ;;  %v406_v60 = vand.u32 4294901760, %v405_v41  ;;  %v3946_v7 = vand.u32 4294901760, %v65_v28 }
  0x90   :  { %390 = vmatprep.mubr.f32.mxu1 %v4536_v31  ;;  %1639 = vmatprep.mubr.f32.mxu0 %v4536_v31  ;;  %4595 = vst [vmem:[#allocation66_spill] sm:$0xff] %v3960_v24  ;;  %v3982_v44 = vsub.f32 %v68_v23, %v3972_v55 }
  0x91   :  { %v3955_v41 = vsub.f32 %v65_v28, %v3946_v7  ;;  %v459_v28 = vand.u32 4294901760, %v3960_v24 }
  0x92   :  { %4597 = vst [vmem:[#allocation68_spill] sm:$0xff] %v3982_v44  ;;  %v481_v10 = vand.u32 4294901760, %v3982_v44 }
  0x93   :  { %396 = vmatmul.mubr.f32.gmra.mrb[34].mxu1 %v395_v38  ;;  %1643 = vmatmul.mubr.f32.gmra.mrb[34].mxu0 %v393_v18  ;;  %v427_v18 = vsub.f32 %v3930_v17, %v426_v45  ;;  %v437_v38 = vand.u32 4294901760, %v3944_v16  ;;  %4594 = vst [vmem:[#allocation65_spill] sm:$0xff] %v3955_v41  ;;  %v448_v2 = vand.u32 4294901760, %v3955_v41 }
  0x94   :  { %401 = vmatprep.mubr.f32.mxu1 %v4536_v31  ;;  %1648 = vmatprep.mubr.f32.mxu0 %v4536_v31 }
  0x97   :  { %407 = vmatmul.mubr.f32.gmra.mrb[36].mxu1 %v406_v60  ;;  %1652 = vmatmul.mubr.f32.gmra.mrb[36].mxu0 %v404_v33  ;;  %v428_v33 = vand.u32 4294901760, %v427_v18  ;;  %v438_v60 = vsub.f32 %v3944_v16, %v437_v38  ;;  %v69_v16 = vld [vmem:[#allocation2 + $0xd0] sm:$0xff]  ;;  %v70_v18 = vld [vmem:[#allocation2 + $0xd8] sm:$0xff] }
  0x98   :  { %412 = vmatprep.mubr.f32.mxu1 %v4536_v31  ;;  %1657 = vmatprep.mubr.f32.mxu0 %v4536_v31  ;;  %v3991_v17 = vand.u32 4294901760, %v70_v18 }
  0x9a   :  { %v4001_v59 = vsub.f32 %v70_v18, %v3991_v17 }
  0x9b   :  { %418 = vmatmul.mubr.f32.gmra.mrb[38].mxu1 %v417_v58  ;;  %1661 = vmatmul.mubr.f32.gmra.mrb[38].mxu0 %v415_v37  ;;  %v439_v58 = vand.u32 4294901760, %v438_v60  ;;  %v449_v37 = vsub.f32 %v3955_v41, %v448_v2  ;;  %v470_v60 = vand.u32 4294901760, %v3970_v39  ;;  %v3986_v41 = vand.u32 4294901760, %v69_v16 }
  0x9c   :  { %423 = vmatprep.mubr.f32.mxu1 %v4536_v31  ;;  %1666 = vmatprep.mubr.f32.mxu0 %v4536_v31  ;;  %4599 = vst [vmem:[#allocation70_spill] sm:$0xff] %v4001_v59 }
  0x9f   :  { %429 = vmatmul.mubr.f32.gmra.mrb[40].mxu1 %v428_v33  ;;  %1670 = vmatmul.mubr.f32.gmra.mrb[40].mxu0 %v426_v45  ;;  %v450_v45 = vand.u32 4294901760, %v449_v37  ;;  %v460_v33 = vsub.f32 %v3960_v24, %v459_v28  ;;  %v71_v37 = vld [vmem:[#allocation2 + $0xe0] sm:$0xff]  ;;  %v482_v24 = vsub.f32 %v3982_v44, %v481_v10 }
  0xa0   :  { %434 = vmatprep.mubr.f32.mxu1 %v4536_v31  ;;  %1675 = vmatprep.mubr.f32.mxu0 %v4536_v31  ;;  %v4003_v5 = vand.u32 4294901760, %v71_v37 }
  0xa1   :  { %v461_v23 = vand.u32 4294901760, %v460_v33  ;;  %v483_v33 = vand.u32 4294901760, %v482_v24  ;;  %v73_v24 = vld [vmem:[#allocation2 + $0xf0] sm:$0xff] }
  0xa2   :  { %v4010_v44 = vsub.f32 %v71_v37, %v4003_v5  ;;  %v4026_v49 = vand.u32 4294901760, %v73_v24 }
  0xa3   :  { %440 = vmatmul.mubr.f32.gmra.mrb[42].mxu1 %v439_v58  ;;  %1679 = vmatmul.mubr.f32.gmra.mrb[42].mxu0 %v437_v38  ;;  %v471_v38 = vsub.f32 %v3970_v39, %v470_v60  ;;  %v3995_v58 = vsub.f32 %v69_v16, %v3986_v41  ;;  %v72_v16 = vld [vmem:[#allocation2 + $0xe8] sm:$0xff]  ;;  %v503_v39 = vand.u32 4294901760, %v4001_v59 }
  0xa4   :  { %445 = vmatprep.mubr.f32.mxu1 %v4536_v31  ;;  %1684 = vmatprep.mubr.f32.mxu0 %v4536_v31  ;;  %v514_v37 = vand.u32 4294901760, %v4010_v44 }
  0xa5   :  { %4598 = vst [vmem:[#allocation69_spill] sm:$0xff] %v3995_v58 }
  0xa7   :  { %451 = vmatmul.mubr.f32.gmra.mrb[44].mxu1 %v450_v45  ;;  %1688 = vmatmul.mubr.f32.gmra.mrb[44].mxu0 %v448_v2  ;;  %v472_v2 = vand.u32 4294901760, %v471_v38  ;;  %v492_v45 = vand.u32 4294901760, %v3995_v58  ;;  %v74_v38 = vld [vmem:[#allocation2 + $0xf8] sm:$0xff] }
  0xa8   :  { %456 = vmatprep.mubr.f32.mxu1 %v4536_v31  ;;  %1693 = vmatprep.mubr.f32.mxu0 %v4536_v31 }
  0xa9   :  { %v493_v18 = vsub.f32 %v3995_v58, %v492_v45 }
  0xab   :  { %462 = vmatmul.mubr.f32.gmra.mrb[46].mxu1 %v461_v23  ;;  %1697 = vmatmul.mubr.f32.gmra.mrb[46].mxu0 %v459_v28  ;;  %v4013_v23 = vand.u32 4294901760, %v72_v16  ;;  %v515_v28 = vsub.f32 %v4010_v44, %v514_v37 }
  0xac   :  { %467 = vmatprep.mubr.f32.mxu1 %v4536_v31  ;;  %1702 = vmatprep.mubr.f32.mxu0 %v4536_v31 }
  0xad   :  { %v4024_v58 = vsub.f32 %v72_v16, %v4013_v23  ;;  %v516_v16 = vand.u32 4294901760, %v515_v28 }
  0xaf   :  { %473 = vmatmul.mubr.f32.gmra.mrb[48].mxu1 %v472_v2  ;;  %1706 = vmatmul.mubr.f32.gmra.mrb[48].mxu0 %v470_v60  ;;  %v494_v60 = vand.u32 4294901760, %v493_v18  ;;  %v504_v2 = vsub.f32 %v4001_v59, %v503_v39  ;;  %v4035_v18 = vand.u32 4294901760, %v74_v38 }
  0xb0   :  { %478 = vmatprep.mubr.f32.mxu1 %v4536_v31  ;;  %1711 = vmatprep.mubr.f32.mxu0 %v4536_v31 }
  0xb1   :  { %v505_v15 = vand.u32 4294901760, %v504_v2 }
  0xb3   :  { %484 = vmatmul.mubr.f32.gmra.mrb[50].mxu1 %v483_v33  ;;  %1715 = vmatmul.mubr.f32.gmra.mrb[50].mxu0 %v481_v10  ;;  %v525_v10 = vand.u32 4294901760, %v4024_v58  ;;  %v4033_v33 = vsub.f32 %v73_v24, %v4026_v49 }
  0xb4   :  { %489 = vmatprep.mubr.f32.mxu1 %v4536_v31  ;;  %1720 = vmatprep.mubr.f32.mxu0 %v4536_v31 }
  0xb5   :  { %v526_v59 = vsub.f32 %v4024_v58, %v525_v10 }
  0xb7   :  { %495 = vmatmul.mubr.f32.gmra.mrb[52].mxu1 %v494_v60  ;;  %1724 = vmatmul.mubr.f32.gmra.mrb[52].mxu0 %v492_v45  ;;  %v536_v60 = vand.u32 4294901760, %v4033_v33  ;;  %v4042_v45 = vsub.f32 %v74_v38, %v4035_v18  ;;  %v527_v24 = vand.u32 4294901760, %v526_v59  ;;  %v4600_v38 = vld [vmem:[#allocation22_spill] sm:$0xff] }
  0xb8   :  { %500 = vmatprep.mubr.f32.mxu1 %v4536_v31  ;;  %1729 = vmatprep.mubr.f32.mxu0 %v4536_v31 }
  0xb9   :  { %v537_v2 = vsub.f32 %v4033_v33, %v536_v60 }
  0xbb   :  { %506 = vmatmul.mubr.f32.gmra.mrb[54].mxu1 %v505_v15  ;;  %1733 = vmatmul.mubr.f32.gmra.mrb[54].mxu0 %v503_v39  ;;  %v547_v15 = vand.u32 4294901760, %v4042_v45  ;;  %v538_v39 = vand.u32 4294901760, %v537_v2  ;;  %v4605_v2 = vld [vmem:[#allocation15_spill] sm:$0xff] }
  0xbc   :  { %511 = vmatprep.mubr.f32.mxu1 %v4536_v31  ;;  %1738 = vmatprep.mubr.f32.mxu0 %v4536_v31 }
  0xbd   :  { %v548_v28 = vsub.f32 %v4042_v45, %v547_v15 }
  0xbf   :  { %517 = vmatmul.mubr.f32.gmra.mrb[56].mxu1 %v516_v16  ;;  %1742 = vmatmul.mubr.f32.gmra.mrb[56].mxu0 %v514_v37  ;;  %v549_v59 = vand.u32 4294901760, %v548_v28  ;;  %v4601_v37 = vld [vmem:[#allocation23_spill] sm:$0xff]  ;;  %v4608_v28 = vld [vmem:[#allocation16_spill] sm:$0xff] }
  0xc0   :  { %522 = vmatprep.mubr.f32.mxu1 %v4536_v31  ;;  %1747 = vmatprep.mubr.f32.mxu0 %v4536_v31  ;;  %v4602_v16 = vld [vmem:[#allocation27_spill] sm:$0xff] }
  0xc3   :  { %528 = vmatmul.mubr.f32.gmra.mrb[58].mxu1 %v527_v24  ;;  %1751 = vmatmul.mubr.f32.gmra.mrb[58].mxu0 %v525_v10  ;;  %v2645_v10 = vpack.c.bf16 %v4601_v37, %v4600_v38  ;;  %v4604_v24 = vpack.c.bf16 %v3440_v6, %v3435_v3  ;;  %v4609_v3 = vpack.c.bf16 %v3540_v35, %v3508_v13  ;;  %v4610_v6 = vld [vmem:[#allocation17_spill] sm:$0xff]  ;;  %v4615_v13 = vld [vmem:[#allocation19_spill] sm:$0xff] }
  0xc4   :  { %533 = vmatprep.mubr.f32.mxu1 %v4536_v31  ;;  %1756 = vmatprep.mubr.f32.mxu0 %v4536_v31  ;;  %v4614_v35 = vpack.c.bf16 %v3603_v21, %v3598_v43  ;;  %v4616_v38 = vld [vmem:[#allocation37_spill] sm:$0xff]  ;;  %v4619_v43 = vpack.c.bf16 %v3672_v32, %v3667_v22  ;;  %v4623_v32 = vpack.c.bf16 %v3723_v11, %v3718_v56 }
  0xc5   :  { %v4620_v21 = vld [vmem:[#allocation21_spill] sm:$0xff]  ;;  %v4627_v11 = vpack.c.bf16 %v3773_v36, %v3755_v14  ;;  %v2671_v37 = vpack.c.bf16 %v3841_v12, %v3822_v4  ;;  %v2673_v14 = vpack.c.bf16 %v3851_v54, %v3846_v53  ;;  %v4631_v36 = vld [vmem:[#allocation35_spill] sm:$0xff]  ;;  %v4632_v4 = vld [vmem:[#allocation38_spill] sm:$0xff] }
  0xc6   :  { %v4624_v22 = vld [vmem:[#allocation25_spill] sm:$0xff]  ;;  %v4635_v12 = vld [vmem:[#allocation47_spill] sm:$0xff]  ;;  %v4636_v53 = vld [vmem:[#allocation50_spill] sm:$0xff] }
  0xc7   :  { %539 = vmatmul.mubr.f32.gmra.mrb[60].mxu1 %v538_v39  ;;  %1760 = vmatmul.mubr.f32.gmra.mrb[60].mxu0 %v536_v60  ;;  %v4603_v60 = vld [vmem:[#allocation14_spill] sm:$0xff]  ;;  %v4607_v39 = vpack.c.bf16 %v3499_v27, %v4590_v61  ;;  %v4612_v27 = vpack.c.bf16 %v3577_v50, %v3568_v63  ;;  %v4617_v63 = vpack.c.bf16 %v3630_v8, %v3625_v20  ;;  %v4618_v50 = vld [vmem:[#allocation20_spill] sm:$0xff]  ;;  %v4628_v56 = vld [vmem:[#allocation29_spill] sm:$0xff] }
  0xc8   :  { %544 = vmatprep.mubr.f32.mxu1 %v4536_v31  ;;  %1765 = vmatprep.mubr.f32.mxu0 %v4536_v31  ;;  %v4613_v61 = vld [vmem:[#allocation18_spill] sm:$0xff]  ;;  %v4621_v20 = vpack.c.bf16 %v3700_v19, %v3677_v0  ;;  %v4622_v8 = vld [vmem:[#allocation24_spill] sm:$0xff]  ;;  %v4625_v0 = vpack.c.bf16 %v3735_v46, %v3730_v62  ;;  %v4629_v62 = vpack.c.bf16 %v3802_v57, %v3782_v9  ;;  %v4637_v54 = vld [vmem:[#allocation51_spill] sm:$0xff] }
  0xc9   :  { %v4626_v19 = vld [vmem:[#allocation28_spill] sm:$0xff]  ;;  %v4630_v46 = vld [vmem:[#allocation34_spill] sm:$0xff] }
  0xca   :  { %v4633_v9 = vld [vmem:[#allocation44_spill] sm:$0xff]  ;;  %v4634_v57 = vld [vmem:[#allocation46_spill] sm:$0xff] }
  0xcb   :  { %550 = vmatmul.mubr.f32.gmra.mrb[62].mxu1 %v549_v59  ;;  %1769 = vmatmul.mubr.f32.gmra.mrb[62].mxu0 %v547_v15  ;;  %v4606_v15 = vld [vmem:[#allocation31_spill] sm:$0xff]  ;;  %v4611_v59 = vld [vmem:[#allocation32_spill] sm:$0xff] }
  0xcc   :  { %780 = vmatprep.mubr.f32.mxu1 %v4536_v31  ;;  %1935 = vmatprep.mubr.f32.mxu0 %v4536_v31 }
  0xcf   :  { %782 = vmatmul.mubr.f32.vlgmr.msra.gmra.mrb[0].mxu1 %v4602_v16  ;;  %1937 = vmatmul.mubr.f32.vlgmr.msra.gmra.mrb[0].mxu0 %v4602_v16 }
  0xd0   :  { %2646 = vmatpush1.bf16.msra.mxu1 %v2645_v10  ;;  %2742 = vmatpush1.bf16.msra.mxu0 %v4603_v60  ;;  %v4638_v10 = vld [vmem:[#allocation54_spill] sm:$0xff]  ;;  %v4639_v60 = vld [vmem:[#allocation55_spill] sm:$0xff] }
  0xd1   :  { %787 = vmatprep.mubr.f32.mxu1 %v4536_v31  ;;  %1942 = vmatprep.mubr.f32.mxu0 %v4536_v31 }
  0xd2   :  { %2648 = vmatprep.subr.bf16.mxu1 %v4604_v24  ;;  %2744 = vmatprep.subr.bf16.mxu0 %v4605_v2  ;;  %v4640_v24 = vld [vmem:[#allocation57_spill] sm:$0xff]  ;;  %v4641_v2 = vld [vmem:[#allocation59_spill] sm:$0xff] }
  0xd3   :  { %789 = vmatmul.mubr.f32.gmra.mrb[2].mxu1 %v4606_v15  ;;  %1944 = vmatmul.mubr.f32.gmra.mrb[2].mxu0 %v4606_v15 }
  0xd4   :  { %794 = vmatprep.mubr.f32.mxu1 %v4536_v31  ;;  %1949 = vmatprep.mubr.f32.mxu0 %v4536_v31 }
  0xd5   :  { %2650 = vmatpush1.bf16.msra.mxu1 %v4607_v39  ;;  %2746 = vmatpush1.bf16.msra.mxu0 %v4608_v28  ;;  %v4642_v39 = vld [vmem:[#allocation30_spill] sm:$0xff]  ;;  %v4643_v28 = vld [vmem:[#allocation33_spill] sm:$0xff] }
  0xd6   :  { %2652 = vmatprep.subr.bf16.mxu1 %v4609_v3  ;;  %2748 = vmatprep.subr.bf16.mxu0 %v4610_v6  ;;  %v4644_v3 = vld [vmem:[#allocation36_spill] sm:$0xff]  ;;  %v4647_v6 = vld [vmem:[#allocation41_spill] sm:$0xff] }
  0xd7   :  { %796 = vmatmul.mubr.f32.gmra.mrb[4].mxu1 %v4611_v59  ;;  %1951 = vmatmul.mubr.f32.gmra.mrb[4].mxu0 %v4611_v59 }
  0xd8   :  { %801 = vmatprep.mubr.f32.mxu1 %v4536_v31  ;;  %1956 = vmatprep.mubr.f32.mxu0 %v4536_v31 }
  0xd9   :  { %2654 = vmatpush1.bf16.msra.mxu1 %v4612_v27  ;;  %2750 = vmatpush1.bf16.msra.mxu0 %v4613_v61  ;;  %v4653_v27 = vld [vmem:[#allocation52_spill] sm:$0xff]  ;;  %v4654_v61 = vld [vmem:[#allocation53_spill] sm:$0xff] }
  0xda   :  { %2656 = vmatprep.subr.bf16.mxu1 %v4614_v35  ;;  %2752 = vmatprep.subr.bf16.mxu0 %v4615_v13  ;;  %v4655_v35 = vld [vmem:[#allocation56_spill] sm:$0xff]  ;;  %v4656_v13 = vld [vmem:[#allocation58_spill] sm:$0xff] }
  0xdb   :  { %803 = vmatmul.mubr.f32.gmra.mrb[6].mxu1 %v4616_v38  ;;  %1958 = vmatmul.mubr.f32.gmra.mrb[6].mxu0 %v4616_v38 }
  0xdc   :  { %808 = vmatprep.mubr.f32.mxu1 %v4536_v31  ;;  %1963 = vmatprep.mubr.f32.mxu0 %v4536_v31 }
  0xdd   :  { %2658 = vmatpush1.bf16.msra.mxu1 %v4617_v63  ;;  %2754 = vmatpush1.bf16.msra.mxu0 %v4618_v50  ;;  %v4658_v63 = vld [vmem:[#allocation61_spill] sm:$0xff]  ;;  %v4660_v50 = vld [vmem:[#allocation26_spill] sm:$0xff] }
  0xde   :  { %2660 = vmatprep.subr.bf16.mxu1 %v4619_v43  ;;  %2756 = vmatprep.subr.bf16.mxu0 %v4620_v21 }
  0xdf   :  { %810 = vmatmul.mubr.f32.gmra.mrb[8].mxu1 %v3554_v25  ;;  %1965 = vmatmul.mubr.f32.gmra.mrb[8].mxu0 %v3554_v25 }
  0xe0   :  { %815 = vmatprep.mubr.f32.mxu1 %v4536_v31  ;;  %1970 = vmatprep.mubr.f32.mxu0 %v4536_v31 }
  0xe1   :  { %2662 = vmatpush1.bf16.msra.mxu1 %v4621_v20  ;;  %2758 = vmatpush1.bf16.msra.mxu0 %v4622_v8 }
  0xe2   :  { %2664 = vmatprep.subr.bf16.mxu1 %v4623_v32  ;;  %2760 = vmatprep.subr.bf16.mxu0 %v4624_v22 }
  0xe3   :  { %817 = vmatmul.mubr.f32.gmra.mrb[10].mxu1 %v3590_v30  ;;  %1972 = vmatmul.mubr.f32.gmra.mrb[10].mxu0 %v3590_v30 }
  0xe4   :  { %822 = vmatprep.mubr.f32.mxu1 %v4536_v31  ;;  %1977 = vmatprep.mubr.f32.mxu0 %v4536_v31 }
  0xe5   :  { %2666 = vmatpush1.bf16.msra.mxu1 %v4625_v0  ;;  %2762 = vmatpush1.bf16.msra.mxu0 %v4626_v19 }
  0xe6   :  { %2668 = vmatprep.subr.bf16.mxu1 %v4627_v11  ;;  %2764 = vmatprep.subr.bf16.mxu0 %v4628_v56 }
  0xe7   :  { %824 = vmatmul.mubr.f32.gmra.mrb[12].mxu1 %v3617_v26  ;;  %1979 = vmatmul.mubr.f32.gmra.mrb[12].mxu0 %v3617_v26 }
  0xe8   :  { %829 = vmatprep.mubr.f32.mxu1 %v4536_v31  ;;  %1984 = vmatprep.mubr.f32.mxu0 %v4536_v31 }
  0xe9   :  { %2670 = vmatpush1.bf16.msra.mxu1 %v4629_v62  ;;  %2766 = vmatpush1.bf16.msra.mxu0 %v4630_v46 }
  0xea   :  { %2672 = vmatprep.subr.bf16.mxu1 %v2671_v37  ;;  %2768 = vmatprep.subr.bf16.mxu0 %v4631_v36 }
  0xeb   :  { %831 = vmatmul.mubr.f32.gmra.mrb[14].mxu1 %v3634_v1  ;;  %1986 = vmatmul.mubr.f32.gmra.mrb[14].mxu0 %v3634_v1 }
  0xec   :  { %836 = vmatprep.mubr.f32.mxu1 %v4536_v31  ;;  %1991 = vmatprep.mubr.f32.mxu0 %v4536_v31 }
  0xed   :  { %2674 = vmatpush1.bf16.msra.mxu1 %v2673_v14  ;;  %2770 = vmatpush1.bf16.msra.mxu0 %v4632_v4 }
  0xef   :  { %838 = vmatmul.mubr.f32.gmra.mrb[16].mxu1 %v4633_v9  ;;  %1993 = vmatmul.mubr.f32.gmra.mrb[16].mxu0 %v4633_v9 }
  0xf0   :  { %843 = vmatprep.mubr.f32.mxu1 %v4536_v31  ;;  %1998 = vmatprep.mubr.f32.mxu0 %v4536_v31 }
  0xf3   :  { %845 = vmatmul.mubr.f32.gmra.mrb[18].mxu1 %v4634_v57  ;;  %2000 = vmatmul.mubr.f32.gmra.mrb[18].mxu0 %v4634_v57 }
  0xf4   :  { %850 = vmatprep.mubr.f32.mxu1 %v4536_v31  ;;  %2005 = vmatprep.mubr.f32.mxu0 %v4536_v31 }
  0xf7   :  { %852 = vmatmul.mubr.f32.gmra.mrb[20].mxu1 %v4635_v12  ;;  %2007 = vmatmul.mubr.f32.gmra.mrb[20].mxu0 %v4635_v12 }
  0xf8   :  { %857 = vmatprep.mubr.f32.mxu1 %v4536_v31  ;;  %2012 = vmatprep.mubr.f32.mxu0 %v4536_v31 }
  0xfb   :  { %859 = vmatmul.mubr.f32.gmra.mrb[22].mxu1 %v4636_v53  ;;  %2014 = vmatmul.mubr.f32.gmra.mrb[22].mxu0 %v4636_v53 }
  0xfc   :  { %864 = vmatprep.mubr.f32.mxu1 %v4536_v31  ;;  %2019 = vmatprep.mubr.f32.mxu0 %v4536_v31 }
  0xff   :  { %866 = vmatmul.mubr.f32.gmra.mrb[24].mxu1 %v4637_v54  ;;  %2021 = vmatmul.mubr.f32.gmra.mrb[24].mxu0 %v4637_v54 }
 0x100   :  { %871 = vmatprep.mubr.f32.mxu1 %v4536_v31  ;;  %2026 = vmatprep.mubr.f32.mxu0 %v4536_v31 }
 0x103   :  { %873 = vmatmul.mubr.f32.gmra.mrb[26].mxu1 %v4638_v10  ;;  %2028 = vmatmul.mubr.f32.gmra.mrb[26].mxu0 %v4638_v10 }
 0x104   :  { %878 = vmatprep.mubr.f32.mxu1 %v4536_v31  ;;  %2033 = vmatprep.mubr.f32.mxu0 %v4536_v31 }
 0x107   :  { %880 = vmatmul.mubr.f32.gmra.mrb[28].mxu1 %v4639_v60  ;;  %2035 = vmatmul.mubr.f32.gmra.mrb[28].mxu0 %v4639_v60 }
 0x108   :  { %885 = vmatprep.mubr.f32.mxu1 %v4536_v31  ;;  %2040 = vmatprep.mubr.f32.mxu0 %v4536_v31 }
 0x10b   :  { %887 = vmatmul.mubr.f32.gmra.mrb[30].mxu1 %v4640_v24  ;;  %2042 = vmatmul.mubr.f32.gmra.mrb[30].mxu0 %v4640_v24 }
 0x10c   :  { %892 = vmatprep.mubr.f32.mxu1 %v4536_v31  ;;  %2047 = vmatprep.mubr.f32.mxu0 %v4536_v31 }
 0x10f   :  { %894 = vmatmul.mubr.f32.gmra.mrb[32].mxu1 %v4641_v2  ;;  %2049 = vmatmul.mubr.f32.gmra.mrb[32].mxu0 %v4641_v2 }
 0x110   :  { %899 = vmatprep.mubr.f32.mxu1 %v4536_v31  ;;  %2054 = vmatprep.mubr.f32.mxu0 %v4536_v31 }
 0x113   :  { %901 = vmatmul.mubr.f32.gmra.mrb[34].mxu1 %v3873_v29  ;;  %2056 = vmatmul.mubr.f32.gmra.mrb[34].mxu0 %v3873_v29 }
 0x114   :  { %906 = vmatprep.mubr.f32.mxu1 %v4536_v31  ;;  %2061 = vmatprep.mubr.f32.mxu0 %v4536_v31 }
 0x117   :  { %908 = vmatmul.mubr.f32.gmra.mrb[36].mxu1 %v3890_v52  ;;  %2063 = vmatmul.mubr.f32.gmra.mrb[36].mxu0 %v3890_v52 }
 0x118   :  { %913 = vmatprep.mubr.f32.mxu1 %v4536_v31  ;;  %2068 = vmatprep.mubr.f32.mxu0 %v4536_v31 }
 0x11b   :  { %915 = vmatmul.mubr.f32.gmra.mrb[38].mxu1 %v3897_v47  ;;  %2070 = vmatmul.mubr.f32.gmra.mrb[38].mxu0 %v3897_v47 }
 0x11c   :  { %920 = vmatprep.mubr.f32.mxu1 %v4536_v31  ;;  %2075 = vmatprep.mubr.f32.mxu0 %v4536_v31 }
 0x11f   :  { %922 = vmatmul.mubr.f32.gmra.mrb[40].mxu1 %v3923_v42  ;;  %2077 = vmatmul.mubr.f32.gmra.mrb[40].mxu0 %v3923_v42 }
 0x120   :  { %927 = vmatprep.mubr.f32.mxu1 %v4536_v31  ;;  %2082 = vmatprep.mubr.f32.mxu0 %v4536_v31 }
 0x123   :  { %929 = vmatmul.mubr.f32.gmra.mrb[42].mxu1 %v3933_v34  ;;  %2084 = vmatmul.mubr.f32.gmra.mrb[42].mxu0 %v3933_v34 }
 0x124   :  { %934 = vmatprep.mubr.f32.mxu1 %v4536_v31  ;;  %2089 = vmatprep.mubr.f32.mxu0 %v4536_v31 }
 0x127   :  { %936 = vmatmul.mubr.f32.gmra.mrb[44].mxu1 %v3946_v7  ;;  %2091 = vmatmul.mubr.f32.gmra.mrb[44].mxu0 %v3946_v7 }
 0x128   :  { %941 = vmatprep.mubr.f32.mxu1 %v4536_v31  ;;  %2096 = vmatprep.mubr.f32.mxu0 %v4536_v31 }
 0x12b   :  { %943 = vmatmul.mubr.f32.gmra.mrb[46].mxu1 %v3950_v48  ;;  %2098 = vmatmul.mubr.f32.gmra.mrb[46].mxu0 %v3950_v48 }
 0x12c   :  { %948 = vmatprep.mubr.f32.mxu1 %v4536_v31  ;;  %2103 = vmatprep.mubr.f32.mxu0 %v4536_v31 }
 0x12f   :  { %950 = vmatmul.mubr.f32.gmra.mrb[48].mxu1 %v3962_v51  ;;  %2105 = vmatmul.mubr.f32.gmra.mrb[48].mxu0 %v3962_v51 }
 0x130   :  { %955 = vmatprep.mubr.f32.mxu1 %v4536_v31  ;;  %2110 = vmatprep.mubr.f32.mxu0 %v4536_v31 }
 0x133   :  { %957 = vmatmul.mubr.f32.gmra.mrb[50].mxu1 %v3972_v55  ;;  %2112 = vmatmul.mubr.f32.gmra.mrb[50].mxu0 %v3972_v55 }
 0x134   :  { %962 = vmatprep.mubr.f32.mxu1 %v4536_v31  ;;  %2117 = vmatprep.mubr.f32.mxu0 %v4536_v31 }
 0x137   :  { %964 = vmatmul.mubr.f32.gmra.mrb[52].mxu1 %v3986_v41  ;;  %2119 = vmatmul.mubr.f32.gmra.mrb[52].mxu0 %v3986_v41 }
 0x138   :  { %969 = vmatprep.mubr.f32.mxu1 %v4536_v31  ;;  %2124 = vmatprep.mubr.f32.mxu0 %v4536_v31 }
 0x13b   :  { %971 = vmatmul.mubr.f32.gmra.mrb[54].mxu1 %v3991_v17  ;;  %2126 = vmatmul.mubr.f32.gmra.mrb[54].mxu0 %v3991_v17 }
 0x13c   :  { %976 = vmatprep.mubr.f32.mxu1 %v4536_v31  ;;  %2131 = vmatprep.mubr.f32.mxu0 %v4536_v31 }
 0x13f   :  { %978 = vmatmul.mubr.f32.gmra.mrb[56].mxu1 %v4003_v5  ;;  %2133 = vmatmul.mubr.f32.gmra.mrb[56].mxu0 %v4003_v5 }
 0x140   :  { %983 = vmatprep.mubr.f32.mxu1 %v4536_v31  ;;  %2138 = vmatprep.mubr.f32.mxu0 %v4536_v31 }
 0x143   :  { %985 = vmatmul.mubr.f32.gmra.mrb[58].mxu1 %v4013_v23  ;;  %2140 = vmatmul.mubr.f32.gmra.mrb[58].mxu0 %v4013_v23 }
 0x144   :  { %990 = vmatprep.mubr.f32.mxu1 %v4536_v31  ;;  %2145 = vmatprep.mubr.f32.mxu0 %v4536_v31 }
 0x147   :  { %992 = vmatmul.mubr.f32.gmra.mrb[60].mxu1 %v4026_v49  ;;  %2147 = vmatmul.mubr.f32.gmra.mrb[60].mxu0 %v4026_v49 }
 0x148   :  { %997 = vmatprep.mubr.f32.mxu1 %v4536_v31  ;;  %2152 = vmatprep.mubr.f32.mxu0 %v4536_v31 }
 0x14b   :  { %999 = vmatmul.mubr.f32.gmra.mrb[62].mxu1 %v4035_v18  ;;  %2154 = vmatmul.mubr.f32.gmra.mrb[62].mxu0 %v4035_v18 }
 0x14c   :  { %1133 = vmatprep.mubr.f32.mxu1 %v4536_v31  ;;  %2256 = vmatprep.mubr.f32.mxu0 %v4536_v31 }
 0x14f   :  { %1136 = vmatmul.mubr.f32.vlgmr.msra.gmra.mrb[0].mxu1 %v4642_v39  ;;  %2258 = vmatmul.mubr.f32.vlgmr.msra.gmra.mrb[0].mxu0 %v4602_v16  ;;  %v4645_v16 = vld [vmem:[#allocation39_spill] sm:$0xff] }
 0x150   :  { %1141 = vmatprep.mubr.f32.mxu1 %v4536_v31  ;;  %2263 = vmatprep.mubr.f32.mxu0 %v4536_v31 }
 0x153   :  { %1144 = vmatmul.mubr.f32.gmra.mrb[2].mxu1 %v4643_v28  ;;  %2265 = vmatmul.mubr.f32.gmra.mrb[2].mxu0 %v4606_v15  ;;  %v4646_v15 = vld [vmem:[#allocation40_spill] sm:$0xff] }
 0x154   :  { %1149 = vmatprep.mubr.f32.mxu1 %v4536_v31  ;;  %2270 = vmatprep.mubr.f32.mxu0 %v4536_v31 }
 0x157   :  { %1152 = vmatmul.mubr.f32.gmra.mrb[4].mxu1 %v4644_v3  ;;  %2272 = vmatmul.mubr.f32.gmra.mrb[4].mxu0 %v4611_v59  ;;  %v4648_v59 = vld [vmem:[#allocation42_spill] sm:$0xff] }
 0x158   :  { %1157 = vmatprep.mubr.f32.mxu1 %v4536_v31  ;;  %2277 = vmatprep.mubr.f32.mxu0 %v4536_v31 }
 0x15b   :  { %1160 = vmatmul.mubr.f32.gmra.mrb[6].mxu1 %v4645_v16  ;;  %2279 = vmatmul.mubr.f32.gmra.mrb[6].mxu0 %v4616_v38  ;;  %v4657_v38 = vld [vmem:[#allocation60_spill] sm:$0xff] }
 0x15c   :  { %1165 = vmatprep.mubr.f32.mxu1 %v4536_v31  ;;  %2284 = vmatprep.mubr.f32.mxu0 %v4536_v31 }
 0x15f   :  { %1168 = vmatmul.mubr.f32.gmra.mrb[8].mxu1 %v4646_v15  ;;  %2286 = vmatmul.mubr.f32.gmra.mrb[8].mxu0 %v3554_v25  ;;  %v4649_v25 = vld [vmem:[#allocation43_spill] sm:$0xff] }
 0x160   :  { %1173 = vmatprep.mubr.f32.mxu1 %v4536_v31  ;;  %2291 = vmatprep.mubr.f32.mxu0 %v4536_v31 }
 0x163   :  { %1176 = vmatmul.mubr.f32.gmra.mrb[10].mxu1 %v4647_v6  ;;  %2293 = vmatmul.mubr.f32.gmra.mrb[10].mxu0 %v3590_v30  ;;  %v4650_v30 = vld [vmem:[#allocation45_spill] sm:$0xff] }
 0x164   :  { %1181 = vmatprep.mubr.f32.mxu1 %v4536_v31  ;;  %2298 = vmatprep.mubr.f32.mxu0 %v4536_v31 }
 0x167   :  { %1184 = vmatmul.mubr.f32.gmra.mrb[12].mxu1 %v4648_v59  ;;  %2300 = vmatmul.mubr.f32.gmra.mrb[12].mxu0 %v3617_v26  ;;  %v4651_v26 = vld [vmem:[#allocation48_spill] sm:$0xff] }
 0x168   :  { %1189 = vmatprep.mubr.f32.mxu1 %v4536_v31  ;;  %2305 = vmatprep.mubr.f32.mxu0 %v4536_v31 }
 0x16b   :  { %1192 = vmatmul.mubr.f32.gmra.mrb[14].mxu1 %v4649_v25  ;;  %2307 = vmatmul.mubr.f32.gmra.mrb[14].mxu0 %v3634_v1  ;;  %v4652_v1 = vld [vmem:[#allocation49_spill] sm:$0xff] }
 0x16c   :  { %1197 = vmatprep.mubr.f32.mxu1 %v4536_v31  ;;  %2312 = vmatprep.mubr.f32.mxu0 %v4536_v31 }
 0x16f   :  { %1200 = vmatmul.mubr.f32.gmra.mrb[16].mxu1 %v4650_v30  ;;  %2314 = vmatmul.mubr.f32.gmra.mrb[16].mxu0 %v4633_v9 }
 0x170   :  { %1205 = vmatprep.mubr.f32.mxu1 %v4536_v31  ;;  %2319 = vmatprep.mubr.f32.mxu0 %v4536_v31 }
 0x173   :  { %1208 = vmatmul.mubr.f32.gmra.mrb[18].mxu1 %v4651_v26  ;;  %2321 = vmatmul.mubr.f32.gmra.mrb[18].mxu0 %v4634_v57 }
 0x174   :  { %1213 = vmatprep.mubr.f32.mxu1 %v4536_v31  ;;  %2326 = vmatprep.mubr.f32.mxu0 %v4536_v31 }
 0x177   :  { %1216 = vmatmul.mubr.f32.gmra.mrb[20].mxu1 %v4652_v1  ;;  %2328 = vmatmul.mubr.f32.gmra.mrb[20].mxu0 %v4635_v12 }
 0x178   :  { %1221 = vmatprep.mubr.f32.mxu1 %v4536_v31  ;;  %2333 = vmatprep.mubr.f32.mxu0 %v4536_v31 }
 0x17b   :  { %1224 = vmatmul.mubr.f32.gmra.mrb[22].mxu1 %v4653_v27  ;;  %2335 = vmatmul.mubr.f32.gmra.mrb[22].mxu0 %v4636_v53 }
 0x17c   :  { %1229 = vmatprep.mubr.f32.mxu1 %v4536_v31  ;;  %2340 = vmatprep.mubr.f32.mxu0 %v4536_v31 }
 0x17f   :  { %1232 = vmatmul.mubr.f32.gmra.mrb[24].mxu1 %v4654_v61  ;;  %2342 = vmatmul.mubr.f32.gmra.mrb[24].mxu0 %v4637_v54 }
 0x180   :  { %1237 = vmatprep.mubr.f32.mxu1 %v4536_v31  ;;  %2347 = vmatprep.mubr.f32.mxu0 %v4536_v31 }
 0x183   :  { %1240 = vmatmul.mubr.f32.gmra.mrb[26].mxu1 %v4655_v35  ;;  %2349 = vmatmul.mubr.f32.gmra.mrb[26].mxu0 %v4638_v10 }
 0x184   :  { %1245 = vmatprep.mubr.f32.mxu1 %v4536_v31  ;;  %2354 = vmatprep.mubr.f32.mxu0 %v4536_v31 }
 0x187   :  { %1248 = vmatmul.mubr.f32.gmra.mrb[28].mxu1 %v4656_v13  ;;  %2356 = vmatmul.mubr.f32.gmra.mrb[28].mxu0 %v4639_v60 }
 0x188   :  { %1253 = vmatprep.mubr.f32.mxu1 %v4536_v31  ;;  %2361 = vmatprep.mubr.f32.mxu0 %v4536_v31 }
 0x18b   :  { %1256 = vmatmul.mubr.f32.gmra.mrb[30].mxu1 %v3859_v40  ;;  %2363 = vmatmul.mubr.f32.gmra.mrb[30].mxu0 %v4640_v24  ;;  %v4659_v40 = vld [vmem:[#allocation62_spill] sm:$0xff] }
 0x18c   :  { %1261 = vmatprep.mubr.f32.mxu1 %v4536_v31  ;;  %2368 = vmatprep.mubr.f32.mxu0 %v4536_v31 }
 0x18f   :  { %1264 = vmatmul.mubr.f32.gmra.mrb[32].mxu1 %v4657_v38  ;;  %2370 = vmatmul.mubr.f32.gmra.mrb[32].mxu0 %v4641_v2 }
 0x190   :  { %1269 = vmatprep.mubr.f32.mxu1 %v4536_v31  ;;  %2375 = vmatprep.mubr.f32.mxu0 %v4536_v31 }
 0x193   :  { %1272 = vmatmul.mubr.f32.gmra.mrb[34].mxu1 %v4658_v63  ;;  %2377 = vmatmul.mubr.f32.gmra.mrb[34].mxu0 %v3873_v29  ;;  %v4661_v29 = vld [vmem:[#allocation63_spill] sm:$0xff] }
 0x194   :  { %1277 = vmatprep.mubr.f32.mxu1 %v4536_v31  ;;  %2382 = vmatprep.mubr.f32.mxu0 %v4536_v31 }
 0x197   :  { %1280 = vmatmul.mubr.f32.gmra.mrb[36].mxu1 %v4659_v40  ;;  %2384 = vmatmul.mubr.f32.gmra.mrb[36].mxu0 %v3890_v52  ;;  %v4662_v52 = vld [vmem:[#allocation64_spill] sm:$0xff] }
 0x198   :  { %1285 = vmatprep.mubr.f32.mxu1 %v4536_v31  ;;  %2389 = vmatprep.mubr.f32.mxu0 %v4536_v31 }
 0x19b   :  { %1288 = vmatmul.mubr.f32.gmra.mrb[38].mxu1 %v4660_v50  ;;  %2391 = vmatmul.mubr.f32.gmra.mrb[38].mxu0 %v3897_v47  ;;  %v4663_v47 = vld [vmem:[#allocation65_spill] sm:$0xff] }
 0x19c   :  { %1293 = vmatprep.mubr.f32.mxu1 %v4536_v31  ;;  %2396 = vmatprep.mubr.f32.mxu0 %v4536_v31 }
 0x19f   :  { %1296 = vmatmul.mubr.f32.gmra.mrb[40].mxu1 %v4661_v29  ;;  %2398 = vmatmul.mubr.f32.gmra.mrb[40].mxu0 %v3923_v42  ;;  %v4664_v42 = vld [vmem:[#allocation66_spill] sm:$0xff] }
 0x1a0   :  { %1301 = vmatprep.mubr.f32.mxu1 %v4536_v31  ;;  %2403 = vmatprep.mubr.f32.mxu0 %v4536_v31 }
 0x1a3   :  { %1304 = vmatmul.mubr.f32.gmra.mrb[42].mxu1 %v4662_v52  ;;  %2405 = vmatmul.mubr.f32.gmra.mrb[42].mxu0 %v3933_v34  ;;  %v4665_v34 = vld [vmem:[#allocation67_spill] sm:$0xff] }
 0x1a4   :  { %1309 = vmatprep.mubr.f32.mxu1 %v4536_v31  ;;  %2410 = vmatprep.mubr.f32.mxu0 %v4536_v31 }
 0x1a7   :  { %1312 = vmatmul.mubr.f32.gmra.mrb[44].mxu1 %v4663_v47  ;;  %2412 = vmatmul.mubr.f32.gmra.mrb[44].mxu0 %v3946_v7  ;;  %v4666_v7 = vld [vmem:[#allocation68_spill] sm:$0xff] }
 0x1a8   :  { %1317 = vmatprep.mubr.f32.mxu1 %v4536_v31  ;;  %2417 = vmatprep.mubr.f32.mxu0 %v4536_v31 }
 0x1ab   :  { %1320 = vmatmul.mubr.f32.gmra.mrb[46].mxu1 %v4664_v42  ;;  %2419 = vmatmul.mubr.f32.gmra.mrb[46].mxu0 %v3950_v48  ;;  %v4667_v48 = vld [vmem:[#allocation69_spill] sm:$0xff] }
 0x1ac   :  { %1325 = vmatprep.mubr.f32.mxu1 %v4536_v31  ;;  %2424 = vmatprep.mubr.f32.mxu0 %v4536_v31 }
 0x1af   :  { %1328 = vmatmul.mubr.f32.gmra.mrb[48].mxu1 %v4665_v34  ;;  %2426 = vmatmul.mubr.f32.gmra.mrb[48].mxu0 %v3962_v51  ;;  %v4668_v51 = vld [vmem:[#allocation70_spill] sm:$0xff] }
 0x1b0   :  { %1333 = vmatprep.mubr.f32.mxu1 %v4536_v31  ;;  %2431 = vmatprep.mubr.f32.mxu0 %v4536_v31 }
 0x1b3   :  { %1336 = vmatmul.mubr.f32.gmra.mrb[50].mxu1 %v4666_v7  ;;  %2433 = vmatmul.mubr.f32.gmra.mrb[50].mxu0 %v3972_v55 }
 0x1b4   :  { %1341 = vmatprep.mubr.f32.mxu1 %v4536_v31  ;;  %2438 = vmatprep.mubr.f32.mxu0 %v4536_v31 }
 0x1b7   :  { %1344 = vmatmul.mubr.f32.gmra.mrb[52].mxu1 %v4667_v48  ;;  %2440 = vmatmul.mubr.f32.gmra.mrb[52].mxu0 %v3986_v41 }
 0x1b8   :  { %1349 = vmatprep.mubr.f32.mxu1 %v4536_v31  ;;  %2445 = vmatprep.mubr.f32.mxu0 %v4536_v31 }
 0x1bb   :  { %1352 = vmatmul.mubr.f32.gmra.mrb[54].mxu1 %v4668_v51  ;;  %2447 = vmatmul.mubr.f32.gmra.mrb[54].mxu0 %v3991_v17 }
 0x1bc   :  { %1357 = vmatprep.mubr.f32.mxu1 %v4536_v31  ;;  %2452 = vmatprep.mubr.f32.mxu0 %v4536_v31 }
 0x1bf   :  { %1360 = vmatmul.mubr.f32.gmra.mrb[56].mxu1 %v4010_v44  ;;  %2454 = vmatmul.mubr.f32.gmra.mrb[56].mxu0 %v4003_v5 }
 0x1c0   :  { %1365 = vmatprep.mubr.f32.mxu1 %v4536_v31  ;;  %2459 = vmatprep.mubr.f32.mxu0 %v4536_v31 }
 0x1c3   :  { %1368 = vmatmul.mubr.f32.gmra.mrb[58].mxu1 %v4024_v58  ;;  %2461 = vmatmul.mubr.f32.gmra.mrb[58].mxu0 %v4013_v23 }
 0x1c4   :  { %1373 = vmatprep.mubr.f32.mxu1 %v4536_v31  ;;  %2466 = vmatprep.mubr.f32.mxu0 %v4536_v31 }
 0x1c7   :  { %1376 = vmatmul.mubr.f32.gmra.mrb[60].mxu1 %v4033_v33  ;;  %2468 = vmatmul.mubr.f32.gmra.mrb[60].mxu0 %v4026_v49 }
 0x1c8   :  { %1381 = vmatprep.mubr.f32.mxu1 %v4536_v31  ;;  %2473 = vmatprep.mubr.f32.mxu0 %v4536_v31 }
 0x1cb   :  { %1384 = vmatmul.mubr.f32.gmra.mrb[62].mxu1 %v4042_v45  ;;  %2475 = vmatmul.mubr.f32.gmra.mrb[62].mxu0 %v4035_v18 }
 0x222   :  { %v1137_v5 = vpop.f32.mrb[0].mxu1  ;;  %v2259_v17 = vpop.f32.mrb[0].mxu0 }
 0x223   :  { %v2771_v41 = vadd.f32 %v2259_v17, %v1137_v5  ;;  %v1139_v55 = vpop.f32.mrb[1].mxu1  ;;  %v2261_v44 = vpop.f32.mrb[1].mxu0 }
 0x224   :  { %v2772_v58 = vadd.f32 %v2261_v44, %v1139_v55 }
 0x225   :  { %2481 = vst [vmem:[#allocation7] sm:$0xff] %v2771_v41 }
 0x226   :  { %2513 = vst [vmem:[#allocation8] sm:$0xff] %v2772_v58  ;;  %v1145_v23 = vpop.f32.mrb[2].mxu1  ;;  %v2266_v33 = vpop.f32.mrb[2].mxu0 }
 0x227   :  { %v2773_v43 = vadd.f32 %v2266_v33, %v1145_v23  ;;  %v1147_v49 = vpop.f32.mrb[3].mxu1  ;;  %v2268_v21 = vpop.f32.mrb[3].mxu0 }
 0x228   :  { %v2774_v20 = vadd.f32 %v2268_v21, %v1147_v49 }
 0x229   :  { %2482 = vst [vmem:[#allocation7 + $0x8] sm:$0xff] %v2773_v43 }
 0x22a   :  { %2514 = vst [vmem:[#allocation8 + $0x8] sm:$0xff] %v2774_v20  ;;  %v1153_v31 = vpop.f32.mrb[4].mxu1  ;;  %v2273_v45 = vpop.f32.mrb[4].mxu0 }
 0x22b   :  { %v2775_v8 = vadd.f32 %v2273_v45, %v1153_v31  ;;  %v1155_v18 = vpop.f32.mrb[5].mxu1  ;;  %v2275_v32 = vpop.f32.mrb[5].mxu0 }
 0x22c   :  { %v2776_v22 = vadd.f32 %v2275_v32, %v1155_v18 }
 0x22d   :  { %2483 = vst [vmem:[#allocation7 + $0x10] sm:$0xff] %v2775_v8 }
 0x22e   :  { %2515 = vst [vmem:[#allocation8 + $0x10] sm:$0xff] %v2776_v22  ;;  %v1161_v0 = vpop.f32.mrb[6].mxu1  ;;  %v2280_v19 = vpop.f32.mrb[6].mxu0 }
 0x22f   :  { %v2777_v11 = vadd.f32 %v2280_v19, %v1161_v0  ;;  %v1163_v56 = vpop.f32.mrb[7].mxu1  ;;  %v2282_v37 = vpop.f32.mrb[7].mxu0 }
 0x230   :  { %v2778_v62 = vadd.f32 %v2282_v37, %v1163_v56 }
 0x231   :  { %2484 = vst [vmem:[#allocation7 + $0x18] sm:$0xff] %v2777_v11 }
 0x232   :  { %2516 = vst [vmem:[#allocation8 + $0x18] sm:$0xff] %v2778_v62  ;;  %v1169_v46 = vpop.f32.mrb[8].mxu1  ;;  %v2287_v14 = vpop.f32.mrb[8].mxu0 }
 0x233   :  { %v2779_v36 = vadd.f32 %v2287_v14, %v1169_v46  ;;  %v1171_v4 = vpop.f32.mrb[9].mxu1  ;;  %v2289_v9 = vpop.f32.mrb[9].mxu0 }
 0x234   :  { %v2780_v57 = vadd.f32 %v2289_v9, %v1171_v4 }
 0x235   :  { %2485 = vst [vmem:[#allocation7 + $0x20] sm:$0xff] %v2779_v36 }
 0x236   :  { %2517 = vst [vmem:[#allocation8 + $0x20] sm:$0xff] %v2780_v57  ;;  %v1177_v12 = vpop.f32.mrb[10].mxu1  ;;  %v2294_v53 = vpop.f32.mrb[10].mxu0 }
 0x237   :  { %v2781_v54 = vadd.f32 %v2294_v53, %v1177_v12  ;;  %v1179_v10 = vpop.f32.mrb[11].mxu1  ;;  %v2296_v60 = vpop.f32.mrb[11].mxu0 }
 0x238   :  { %v2782_v24 = vadd.f32 %v2296_v60, %v1179_v10 }
 0x239   :  { %2486 = vst [vmem:[#allocation7 + $0x28] sm:$0xff] %v2781_v54 }
 0x23a   :  { %2518 = vst [vmem:[#allocation8 + $0x28] sm:$0xff] %v2782_v24  ;;  %v1185_v2 = vpop.f32.mrb[12].mxu1  ;;  %v2301_v39 = vpop.f32.mrb[12].mxu0 }
 0x23b   :  { %v2783_v28 = vadd.f32 %v2301_v39, %v1185_v2  ;;  %v1187_v3 = vpop.f32.mrb[13].mxu1  ;;  %v2303_v16 = vpop.f32.mrb[13].mxu0 }
 0x23c   :  { %v2784_v15 = vadd.f32 %v2303_v16, %v1187_v3 }
 0x23d   :  { %2487 = vst [vmem:[#allocation7 + $0x30] sm:$0xff] %v2783_v28 }
 0x23e   :  { %2519 = vst [vmem:[#allocation8 + $0x30] sm:$0xff] %v2784_v15  ;;  %v1193_v6 = vpop.f32.mrb[14].mxu1  ;;  %v2308_v59 = vpop.f32.mrb[14].mxu0 }
 0x23f   :  { %v2785_v25 = vadd.f32 %v2308_v59, %v1193_v6  ;;  %v1195_v30 = vpop.f32.mrb[15].mxu1  ;;  %v2310_v26 = vpop.f32.mrb[15].mxu0 }
 0x240   :  { %v2786_v1 = vadd.f32 %v2310_v26, %v1195_v30 }
 0x241   :  { %2488 = vst [vmem:[#allocation7 + $0x38] sm:$0xff] %v2785_v25 }
 0x242   :  { %2520 = vst [vmem:[#allocation8 + $0x38] sm:$0xff] %v2786_v1  ;;  %v1201_v27 = vpop.f32.mrb[16].mxu1  ;;  %v2315_v61 = vpop.f32.mrb[16].mxu0 }
 0x243   :  { %v2787_v35 = vadd.f32 %v2315_v61, %v1201_v27  ;;  %v1203_v13 = vpop.f32.mrb[17].mxu1  ;;  %v2317_v38 = vpop.f32.mrb[17].mxu0 }
 0x244   :  { %v2788_v63 = vadd.f32 %v2317_v38, %v1203_v13 }
 0x245   :  { %2489 = vst [vmem:[#allocation7 + $0x40] sm:$0xff] %v2787_v35 }
 0x246   :  { %2521 = vst [vmem:[#allocation8 + $0x40] sm:$0xff] %v2788_v63  ;;  %v1209_v40 = vpop.f32.mrb[18].mxu1  ;;  %v2322_v50 = vpop.f32.mrb[18].mxu0 }
 0x247   :  { %v2789_v29 = vadd.f32 %v2322_v50, %v1209_v40  ;;  %v1211_v52 = vpop.f32.mrb[19].mxu1  ;;  %v2324_v47 = vpop.f32.mrb[19].mxu0 }
 0x248   :  { %v2790_v42 = vadd.f32 %v2324_v47, %v1211_v52 }
 0x249   :  { %2490 = vst [vmem:[#allocation7 + $0x48] sm:$0xff] %v2789_v29 }
 0x24a   :  { %2522 = vst [vmem:[#allocation8 + $0x48] sm:$0xff] %v2790_v42  ;;  %v1217_v34 = vpop.f32.mrb[20].mxu1  ;;  %v2329_v7 = vpop.f32.mrb[20].mxu0 }
 0x24b   :  { %v2791_v48 = vadd.f32 %v2329_v7, %v1217_v34  ;;  %v1219_v51 = vpop.f32.mrb[21].mxu1  ;;  %v2331_v5 = vpop.f32.mrb[21].mxu0 }
 0x24c   :  { %v2792_v17 = vadd.f32 %v2331_v5, %v1219_v51 }
 0x24d   :  { %2491 = vst [vmem:[#allocation7 + $0x50] sm:$0xff] %v2791_v48 }
 0x24e   :  { %2523 = vst [vmem:[#allocation8 + $0x50] sm:$0xff] %v2792_v17  ;;  %v1225_v41 = vpop.f32.mrb[22].mxu1  ;;  %v2336_v55 = vpop.f32.mrb[22].mxu0 }
 0x24f   :  { %v2793_v44 = vadd.f32 %v2336_v55, %v1225_v41  ;;  %v1227_v58 = vpop.f32.mrb[23].mxu1  ;;  %v2338_v23 = vpop.f32.mrb[23].mxu0 }
 0x250   :  { %v2794_v33 = vadd.f32 %v2338_v23, %v1227_v58 }
 0x251   :  { %2492 = vst [vmem:[#allocation7 + $0x58] sm:$0xff] %v2793_v44 }
 0x252   :  { %2524 = vst [vmem:[#allocation8 + $0x58] sm:$0xff] %v2794_v33  ;;  %v1233_v43 = vpop.f32.mrb[24].mxu1  ;;  %v2343_v49 = vpop.f32.mrb[24].mxu0 }
 0x253   :  { %v2795_v21 = vadd.f32 %v2343_v49, %v1233_v43  ;;  %v1235_v20 = vpop.f32.mrb[25].mxu1  ;;  %v2345_v31 = vpop.f32.mrb[25].mxu0 }
 0x254   :  { %v2796_v45 = vadd.f32 %v2345_v31, %v1235_v20 }
 0x255   :  { %2493 = vst [vmem:[#allocation7 + $0x60] sm:$0xff] %v2795_v21 }
 0x256   :  { %2525 = vst [vmem:[#allocation8 + $0x60] sm:$0xff] %v2796_v45  ;;  %v1241_v8 = vpop.f32.mrb[26].mxu1  ;;  %v2350_v18 = vpop.f32.mrb[26].mxu0 }
 0x257   :  { %v2797_v32 = vadd.f32 %v2350_v18, %v1241_v8  ;;  %v1243_v22 = vpop.f32.mrb[27].mxu1  ;;  %v2352_v0 = vpop.f32.mrb[27].mxu0 }
 0x258   :  { %v2798_v19 = vadd.f32 %v2352_v0, %v1243_v22 }
 0x259   :  { %2494 = vst [vmem:[#allocation7 + $0x68] sm:$0xff] %v2797_v32 }
 0x25a   :  { %2526 = vst [vmem:[#allocation8 + $0x68] sm:$0xff] %v2798_v19  ;;  %v1249_v11 = vpop.f32.mrb[28].mxu1  ;;  %v2357_v56 = vpop.f32.mrb[28].mxu0 }
 0x25b   :  { %v2799_v37 = vadd.f32 %v2357_v56, %v1249_v11  ;;  %v1251_v62 = vpop.f32.mrb[29].mxu1  ;;  %v2359_v46 = vpop.f32.mrb[29].mxu0 }
 0x25c   :  { %v2800_v14 = vadd.f32 %v2359_v46, %v1251_v62 }
 0x25d   :  { %2495 = vst [vmem:[#allocation7 + $0x70] sm:$0xff] %v2799_v37 }
 0x25e   :  { %2527 = vst [vmem:[#allocation8 + $0x70] sm:$0xff] %v2800_v14  ;;  %v1257_v36 = vpop.f32.mrb[30].mxu1  ;;  %v2364_v4 = vpop.f32.mrb[30].mxu0 }
 0x25f   :  { %v2801_v9 = vadd.f32 %v2364_v4, %v1257_v36  ;;  %v1259_v57 = vpop.f32.mrb[31].mxu1  ;;  %v2366_v12 = vpop.f32.mrb[31].mxu0 }
 0x260   :  { %v2802_v53 = vadd.f32 %v2366_v12, %v1259_v57 }
 0x261   :  { %2496 = vst [vmem:[#allocation7 + $0x78] sm:$0xff] %v2801_v9 }
 0x262   :  { %2528 = vst [vmem:[#allocation8 + $0x78] sm:$0xff] %v2802_v53  ;;  %v1265_v54 = vpop.f32.mrb[32].mxu1  ;;  %v2371_v10 = vpop.f32.mrb[32].mxu0 }
 0x263   :  { %v2803_v60 = vadd.f32 %v2371_v10, %v1265_v54  ;;  %v1267_v24 = vpop.f32.mrb[33].mxu1  ;;  %v2373_v2 = vpop.f32.mrb[33].mxu0 }
 0x264   :  { %v2804_v39 = vadd.f32 %v2373_v2, %v1267_v24 }
 0x265   :  { %2497 = vst [vmem:[#allocation7 + $0x80] sm:$0xff] %v2803_v60 }
 0x266   :  { %2529 = vst [vmem:[#allocation8 + $0x80] sm:$0xff] %v2804_v39  ;;  %v1273_v28 = vpop.f32.mrb[34].mxu1  ;;  %v2378_v3 = vpop.f32.mrb[34].mxu0 }
 0x267   :  { %v2805_v16 = vadd.f32 %v2378_v3, %v1273_v28  ;;  %v1275_v15 = vpop.f32.mrb[35].mxu1  ;;  %v2380_v6 = vpop.f32.mrb[35].mxu0 }
 0x268   :  { %v2806_v59 = vadd.f32 %v2380_v6, %v1275_v15 }
 0x269   :  { %2498 = vst [vmem:[#allocation7 + $0x88] sm:$0xff] %v2805_v16 }
 0x26a   :  { %2530 = vst [vmem:[#allocation8 + $0x88] sm:$0xff] %v2806_v59  ;;  %v1281_v25 = vpop.f32.mrb[36].mxu1  ;;  %v2385_v30 = vpop.f32.mrb[36].mxu0 }
 0x26b   :  { %v2807_v26 = vadd.f32 %v2385_v30, %v1281_v25  ;;  %v1283_v1 = vpop.f32.mrb[37].mxu1  ;;  %v2387_v27 = vpop.f32.mrb[37].mxu0 }
 0x26c   :  { %v2808_v61 = vadd.f32 %v2387_v27, %v1283_v1 }
 0x26d   :  { %2499 = vst [vmem:[#allocation7 + $0x90] sm:$0xff] %v2807_v26 }
 0x26e   :  { %2531 = vst [vmem:[#allocation8 + $0x90] sm:$0xff] %v2808_v61  ;;  %v1289_v35 = vpop.f32.mrb[38].mxu1  ;;  %v2392_v13 = vpop.f32.mrb[38].mxu0 }
 0x26f   :  { %v2809_v38 = vadd.f32 %v2392_v13, %v1289_v35  ;;  %v1291_v63 = vpop.f32.mrb[39].mxu1  ;;  %v2394_v40 = vpop.f32.mrb[39].mxu0 }
 0x270   :  { %v2810_v50 = vadd.f32 %v2394_v40, %v1291_v63 }
 0x271   :  { %2500 = vst [vmem:[#allocation7 + $0x98] sm:$0xff] %v2809_v38 }
 0x272   :  { %2532 = vst [vmem:[#allocation8 + $0x98] sm:$0xff] %v2810_v50  ;;  %v1297_v29 = vpop.f32.mrb[40].mxu1  ;;  %v2399_v52 = vpop.f32.mrb[40].mxu0 }
 0x273   :  { %v2811_v47 = vadd.f32 %v2399_v52, %v1297_v29  ;;  %v1299_v42 = vpop.f32.mrb[41].mxu1  ;;  %v2401_v34 = vpop.f32.mrb[41].mxu0 }
 0x274   :  { %v2812_v7 = vadd.f32 %v2401_v34, %v1299_v42 }
 0x275   :  { %2501 = vst [vmem:[#allocation7 + $0xa0] sm:$0xff] %v2811_v47 }
 0x276   :  { %2533 = vst [vmem:[#allocation8 + $0xa0] sm:$0xff] %v2812_v7  ;;  %v1305_v48 = vpop.f32.mrb[42].mxu1  ;;  %v2406_v51 = vpop.f32.mrb[42].mxu0 }
 0x277   :  { %v2813_v5 = vadd.f32 %v2406_v51, %v1305_v48  ;;  %v1307_v17 = vpop.f32.mrb[43].mxu1  ;;  %v2408_v41 = vpop.f32.mrb[43].mxu0 }
 0x278   :  { %v2814_v55 = vadd.f32 %v2408_v41, %v1307_v17 }
 0x279   :  { %2502 = vst [vmem:[#allocation7 + $0xa8] sm:$0xff] %v2813_v5 }
 0x27a   :  { %2534 = vst [vmem:[#allocation8 + $0xa8] sm:$0xff] %v2814_v55  ;;  %v1313_v44 = vpop.f32.mrb[44].mxu1  ;;  %v2413_v58 = vpop.f32.mrb[44].mxu0 }
 0x27b   :  { %v2815_v23 = vadd.f32 %v2413_v58, %v1313_v44  ;;  %v1315_v33 = vpop.f32.mrb[45].mxu1  ;;  %v2415_v43 = vpop.f32.mrb[45].mxu0 }
 0x27c   :  { %v2816_v49 = vadd.f32 %v2415_v43, %v1315_v33 }
 0x27d   :  { %2503 = vst [vmem:[#allocation7 + $0xb0] sm:$0xff] %v2815_v23 }
 0x27e   :  { %2535 = vst [vmem:[#allocation8 + $0xb0] sm:$0xff] %v2816_v49  ;;  %v1321_v21 = vpop.f32.mrb[46].mxu1  ;;  %v2420_v20 = vpop.f32.mrb[46].mxu0 }
 0x27f   :  { %v2817_v31 = vadd.f32 %v2420_v20, %v1321_v21  ;;  %v1323_v45 = vpop.f32.mrb[47].mxu1  ;;  %v2422_v8 = vpop.f32.mrb[47].mxu0 }
 0x280   :  { %v2818_v18 = vadd.f32 %v2422_v8, %v1323_v45 }
 0x281   :  { %2504 = vst [vmem:[#allocation7 + $0xb8] sm:$0xff] %v2817_v31 }
 0x282   :  { %2536 = vst [vmem:[#allocation8 + $0xb8] sm:$0xff] %v2818_v18  ;;  %v1329_v32 = vpop.f32.mrb[48].mxu1  ;;  %v2427_v22 = vpop.f32.mrb[48].mxu0 }
 0x283   :  { %v2819_v0 = vadd.f32 %v2427_v22, %v1329_v32  ;;  %v1331_v19 = vpop.f32.mrb[49].mxu1  ;;  %v2429_v11 = vpop.f32.mrb[49].mxu0 }
 0x284   :  { %v2820_v56 = vadd.f32 %v2429_v11, %v1331_v19 }
 0x285   :  { %2505 = vst [vmem:[#allocation7 + $0xc0] sm:$0xff] %v2819_v0 }
 0x286   :  { %2537 = vst [vmem:[#allocation8 + $0xc0] sm:$0xff] %v2820_v56  ;;  %v1337_v37 = vpop.f32.mrb[50].mxu1  ;;  %v2434_v62 = vpop.f32.mrb[50].mxu0 }
 0x287   :  { %v2821_v46 = vadd.f32 %v2434_v62, %v1337_v37  ;;  %v1339_v14 = vpop.f32.mrb[51].mxu1  ;;  %v2436_v36 = vpop.f32.mrb[51].mxu0 }
 0x288   :  { %v2822_v4 = vadd.f32 %v2436_v36, %v1339_v14 }
 0x289   :  { %2506 = vst [vmem:[#allocation7 + $0xc8] sm:$0xff] %v2821_v46 }
 0x28a   :  { %2538 = vst [vmem:[#allocation8 + $0xc8] sm:$0xff] %v2822_v4  ;;  %v1345_v9 = vpop.f32.mrb[52].mxu1  ;;  %v2441_v57 = vpop.f32.mrb[52].mxu0 }
 0x28b   :  { %v2823_v12 = vadd.f32 %v2441_v57, %v1345_v9  ;;  %v1347_v53 = vpop.f32.mrb[53].mxu1  ;;  %v2443_v54 = vpop.f32.mrb[53].mxu0 }
 0x28c   :  { %v2824_v10 = vadd.f32 %v2443_v54, %v1347_v53 }
 0x28d   :  { %2507 = vst [vmem:[#allocation7 + $0xd0] sm:$0xff] %v2823_v12 }
 0x28e   :  { %2539 = vst [vmem:[#allocation8 + $0xd0] sm:$0xff] %v2824_v10  ;;  %v1353_v60 = vpop.f32.mrb[54].mxu1  ;;  %v2448_v24 = vpop.f32.mrb[54].mxu0 }
 0x28f   :  { %v2825_v2 = vadd.f32 %v2448_v24, %v1353_v60  ;;  %v1355_v39 = vpop.f32.mrb[55].mxu1  ;;  %v2450_v28 = vpop.f32.mrb[55].mxu0 }
 0x290   :  { %v2826_v3 = vadd.f32 %v2450_v28, %v1355_v39 }
 0x291   :  { %2508 = vst [vmem:[#allocation7 + $0xd8] sm:$0xff] %v2825_v2 }
 0x292   :  { %2540 = vst [vmem:[#allocation8 + $0xd8] sm:$0xff] %v2826_v3  ;;  %v1361_v16 = vpop.f32.mrb[56].mxu1  ;;  %v2455_v15 = vpop.f32.mrb[56].mxu0 }
 0x293   :  { %v2827_v6 = vadd.f32 %v2455_v15, %v1361_v16  ;;  %v1363_v59 = vpop.f32.mrb[57].mxu1  ;;  %v2457_v25 = vpop.f32.mrb[57].mxu0 }
 0x294   :  { %v2828_v30 = vadd.f32 %v2457_v25, %v1363_v59 }
 0x295   :  { %2509 = vst [vmem:[#allocation7 + $0xe0] sm:$0xff] %v2827_v6 }
 0x296   :  { %2541 = vst [vmem:[#allocation8 + $0xe0] sm:$0xff] %v2828_v30  ;;  %v1369_v26 = vpop.f32.mrb[58].mxu1  ;;  %v2462_v1 = vpop.f32.mrb[58].mxu0 }
 0x297   :  { %v2829_v27 = vadd.f32 %v2462_v1, %v1369_v26  ;;  %v1371_v61 = vpop.f32.mrb[59].mxu1  ;;  %v2464_v35 = vpop.f32.mrb[59].mxu0 }
 0x298   :  { %v2830_v13 = vadd.f32 %v2464_v35, %v1371_v61 }
 0x299   :  { %2510 = vst [vmem:[#allocation7 + $0xe8] sm:$0xff] %v2829_v27 }
 0x29a   :  { %2542 = vst [vmem:[#allocation8 + $0xe8] sm:$0xff] %v2830_v13  ;;  %v1377_v38 = vpop.f32.mrb[60].mxu1  ;;  %v2469_v63 = vpop.f32.mrb[60].mxu0 }
 0x29b   :  { %v2831_v40 = vadd.f32 %v2469_v63, %v1377_v38  ;;  %v1379_v50 = vpop.f32.mrb[61].mxu1  ;;  %v2471_v29 = vpop.f32.mrb[61].mxu0 }
 0x29c   :  { %v2832_v52 = vadd.f32 %v2471_v29, %v1379_v50 }
 0x29d   :  { %2511 = vst [vmem:[#allocation7 + $0xf0] sm:$0xff] %v2831_v40 }
 0x29e   :  { %2543 = vst [vmem:[#allocation8 + $0xf0] sm:$0xff] %v2832_v52  ;;  %v1385_v47 = vpop.f32.mrb[62].mxu1  ;;  %v2476_v42 = vpop.f32.mrb[62].mxu0 }
 0x29f   :  { %v2833_v34 = vadd.f32 %v2476_v42, %v1385_v47  ;;  %v1387_v7 = vpop.f32.mrb[63].mxu1  ;;  %v2478_v48 = vpop.f32.mrb[63].mxu0 }
 0x2a0   :  { %v2834_v51 = vadd.f32 %v2478_v48, %v1387_v7 }
 0x2a1   :  { %2512 = vst [vmem:[#allocation7 + $0xf8] sm:$0xff] %v2833_v34 }
 0x2a2   :  { %2544 = vst [vmem:[#allocation8 + $0xf8] sm:$0xff] %v2834_v51 }
 0x2a3   :  { %2549 = vsyncadd [#allocation4], 3840  ;;  %s3203_s1 = smov [#allocation7]  }
 0x2a4   :  { %s2550_s13 = sshll.u32 %s3203_s1, 4  ;;  %s2551_s13 = int_to_ptr.vmem [resolvable:$true] %s2550_s13 }
 0x2a5   :  { %s3144_s14 = scalar_lea.vmem %s2551_s13, 256  ;;  %s3148_s15 = scalar_lea.vmem %s2551_s13, 4096 }
 0x2a6   :  { %p3145_p2 = scmp.ne.s32.totalorder %s2551_s13, %s3144_s14  ;;  %p3149_p3 = scmp.lt.s32.totalorder %s2551_s13, %s2551_s13 }
 0x2a7   :  { %p3150_p4 = scmp.lt.s32.totalorder %s3148_s15, %s3144_s14 }
 0x2a9   :  { %p3151_p5 = por %p3150_p4, %p3149_p3 }
 0x2ab   :  { %p3152_p6 = pnand %p3151_p5, %p3145_p2 }
 0x2ad   :  { %3155 = shalt.err (!%p3152_p6)
}
 0x2ae   :  { %s3156_s18 = scalar_lea.hbm %s4400_s2, 256 }
 0x2af   :  { %p3157_p7 = scmp.ne.s32.totalorder %s4400_s2, %s3156_s18  ;;  %p3160_p8 = scmp.lt.u32.totalorder %s3156_s18, %s4400_s2 }
 0x2b1   :  { %p3162_p9 = pnand %p3160_p8, %p3157_p7 }
 0x2b3   :  { %3165 = shalt.err (!%p3162_p9)
}
 0x2b4   :  { %2556 = dma.vmem_to_hbm [thread:$0]  %s2551_s13, 256, %s4400_s2, [#allocation4], %s3197_s23, %s3197_s23, %s3198_s24  }
 0x2b5   :  { %2561 = vsyncadd [#allocation9], 3840  ;;  %s3204_s27 = smov [#allocation8]  }
 0x2b6   :  { %s2562_s28 = sshll.u32 %s3204_s27, 4  ;;  %s2563_s28 = int_to_ptr.vmem [resolvable:$true] %s2562_s28 }
 0x2b7   :  { %s3166_s29 = scalar_lea.vmem %s2563_s28, 256  ;;  %s3170_s30 = scalar_lea.vmem %s2563_s28, 4096 }
 0x2b8   :  { %p3167_p10 = scmp.ne.s32.totalorder %s2563_s28, %s3166_s29  ;;  %p3171_p11 = scmp.lt.s32.totalorder %s2563_s28, %s2563_s28 }
 0x2b9   :  { %p3172_p12 = scmp.lt.s32.totalorder %s3170_s30, %s3166_s29 }
 0x2bb   :  { %p3173_p13 = por %p3172_p12, %p3171_p11 }
 0x2bd   :  { %p3174_p0 = pnand %p3173_p13, %p3167_p10 }
 0x2bf   :  { %3177 = shalt.err (!%p3174_p0)
}
 0x2c0   :  { %s3178_s6 = scalar_lea.hbm %s4401_s3, 256 }
 0x2c1   :  { %p3179_p1 = scmp.ne.s32.totalorder %s4401_s3, %s3178_s6  ;;  %p3182_p2 = scmp.lt.u32.totalorder %s3178_s6, %s4401_s3 }
 0x2c3   :  { %p3184_p3 = pnand %p3182_p2, %p3179_p1 }
 0x2c5   :  { %3187 = shalt.err (!%p3184_p3)
}
 0x2c6   :  { %2568 = dma.vmem_to_hbm [thread:$0]  %s2563_s28, 256, %s4401_s3, [#allocation9], %s3197_s23, %s3197_s23, %s3198_s24  }
 0x2c7   :  { %3192 = dma.done.wait [#allocation4], 4096  }
 0x2c8   :  { %3193 = vsyncadd [#allocation4], 4294963200 }
 0x2c9   :  { %3194 = dma.done.wait [#allocation9], 4096  }
 0x2ca   :  { %3195 = vsyncadd [#allocation9], 4294963200 }
 0x2cb   :  { %2575 = vsyncpa [#allocation3], 1 }
 0x2cc   :  { %2576 = vsyncpa [#allocation6], 1 }
 0x2cd   :  { %2577 = vsyncpa [#allocation4], 1 }
 0x2ce   :  { %2578 = vsyncpa [#allocation9], 1 }

</bundles_post_ra>
